<compile_context>
chip_gen: v5e
topology: v5e:2x2
jax: 0.10.0
libtpu: 0.0.40
codegen_flags: <defaults>
</compile_context>

<pallas_src>
import functools

import jax
import jax.numpy as jnp
from jax import lax
from jax.experimental import pallas as pl
from jax.experimental.pallas import tpu as pltpu


# ----------------------------------------------------------------------------
# Fused kernel: BiCond BiLSTM encoder + gating head + ensemble combine
# ----------------------------------------------------------------------------
def ensemble_kernel(topic_ref, text_ref, tp_mask_ref, tx_mask_ref,
                    tp_wih_ref, tp_whh_ref, tp_b_ref,
                    tx_wih_ref, tx_whh_ref, tx_b_ref,
                    pred_w_ref, pred_b_ref, clf1_ref, clf2_ref,
                    out_ref,
                    tp_proj, tx_proj,
                    *, H, Tt, Tx, B, out_dim):
    f32 = jnp.float32
    bf16 = jnp.bfloat16
    H2 = 2 * H

    # --- hoisted input projections: ONE bf16 MXU matmul per encoder, bias folded in.
    # Row s*B+b holds, lane-packed per gate block: fwd gates from x_{s,b}, bwd gates from
    # x_{T-1-s,b} (the time reversal is baked into the combined input columns).
    tp_proj[...] = jnp.dot(topic_ref[...], tp_wih_ref[...],
                           preferred_element_type=f32) + tp_b_ref[...]
    tx_proj[...] = jnp.dot(text_ref[...], tx_wih_ref[...],
                           preferred_element_type=f32) + tx_b_ref[...]

    def cell(gates, c):
        # gates: (B, 8H), 4 gate blocks of width 2H = [fwd|bwd], order i, f, g, o.
        sig = jax.nn.sigmoid(gates)          # one wide EUP push
        tnh = jnp.tanh(gates)                # one wide EUP push
        i = sig[:, 0 * H2:1 * H2]
        f = sig[:, 1 * H2:2 * H2]
        g = tnh[:, 2 * H2:3 * H2]
        o = sig[:, 3 * H2:4 * H2]
        c_new = f * c + i * g
        h_new = o * jnp.tanh(c_new)          # third EUP push
        return h_new, c_new

    def bidir_scan(proj_ref, mask_ref, whh_ref, T, init):
        # Fwd and bwd directions run together in one scan; state layout [fwd | bwd] (B, 2H).
        whh = whh_ref[...]                   # (2H, 8H) bf16, resident across this recurrence

        def step(s, carry):
            h, c = carry                                   # (B, 2H) f32 each
            x = proj_ref[pl.ds(s * B, B), :]               # (B, 8H) precomputed projection row
            gates = x + jnp.dot(h.astype(bf16), whh, preferred_element_type=f32)
            h_new, c_new = cell(gates, c)
            m = mask_ref[pl.ds(s * B, B), :]               # (B, 2H) precomputed 0/1 validity
            # lerp update: exact state freeze where m == 0 (padding steps are no-ops)
            return (h + m * (h_new - h), c + m * (c_new - c))

        return lax.fori_loop(0, T, step, init, unroll=True)

    zeros = jnp.zeros((B, H2), f32)
    # topic BiLSTM (zero init), then text BiLSTM conditioned on topic final (h, c)
    h_t, c_t = bidir_scan(tp_proj, tp_mask_ref, tp_whh_ref, Tt, (zeros, zeros))
    h_x, _ = bidir_scan(tx_proj, tx_mask_ref, tx_whh_ref, Tx, (h_t, c_t))

    # --- gating prediction head (Linear + joint softmax, lane-padded) + ensemble combine ---
    # h_x is already [h_fwd | h_bwd]; dropout (eval) = identity.
    logits = jnp.dot(h_x, pred_w_ref[...], preferred_element_type=f32) + pred_b_ref[...]
    mx = jnp.max(logits, axis=-1, keepdims=True)
    e = jnp.exp(logits - mx)                               # padded cols: exp(-1e30 - mx) = 0
    inv = pl.reciprocal(jnp.sum(e, axis=-1, keepdims=True), approx=True)
    gate = e * inv                                         # (B, lanes); first 2*out_dim are real
    g1 = gate[:, 0:out_dim]
    g2 = gate[:, out_dim:2 * out_dim]
    # ensemble combine: (clf_pred * gating_pred).sum(dim=1)
    out_ref[...] = clf1_ref[...] * g1 + clf2_ref[...] * g2


# ----------------------------------------------------------------------------
# Wrapper-side weight / input packing (layout plumbing, not compute hoisting)
# ----------------------------------------------------------------------------
def _pack_gate_cols(wf, wb, H):
    # (R, 4H) fwd + (R, 4H) bwd -> (R, 8H): 4 gate blocks of width 2H, each [fwd | bwd].
    parts = []
    for g in range(4):
        parts.append(wf[:, g * H:(g + 1) * H])
        parts.append(wb[:, g * H:(g + 1) * H])
    return jnp.concatenate(parts, axis=1)


def _pack_input_w(wih_f, wih_b, H):
    # (D, 4H) x2 -> (2D, 8H): rows [0:D] (natural-order input) feed only fwd-gate columns,
    # rows [D:2D] (time-reversed input) feed only bwd-gate columns.
    z = jnp.zeros_like(wih_f)
    return jnp.concatenate([_pack_gate_cols(wih_f, z, H),
                            _pack_gate_cols(jnp.zeros_like(wih_b), wih_b, H)], axis=0)


def _pack_hidden_w(whh_f, whh_b, H):
    # (H, 4H) x2 -> block-diagonal (2H, 8H): [h_f | h_b] @ this = both directions in one matmul.
    return jnp.concatenate([_pack_gate_cols(whh_f, jnp.zeros_like(whh_f), H),
                            _pack_gate_cols(jnp.zeros_like(whh_b), whh_b, H)], axis=0)


def ensemble_forward(params, text_embeddings, text_length, topic_embeddings,
                     topic_length, clf1_pred, clf2_pred):
    B, Tx, Dx = text_embeddings.shape
    _, Tt, Dt = topic_embeddings.shape
    H = params["hidden_dim"]
    out_dim = params["output_dim"]
    n_out = params["pred_w"].shape[1]          # n_clfs * output_dim
    f32, bf16 = jnp.float32, jnp.bfloat16

    # glue: torch transpose(0,1) -> seq-major, then combined [natural | time-reversed] columns
    # so each encoder's input projection is ONE 2-D bf16 matmul in-kernel.
    def seq_major_comb(emb, T, D):
        tbd = jnp.transpose(emb, (1, 0, 2)).astype(f32)        # (T, B, D)
        comb = jnp.concatenate([tbd, tbd[::-1]], axis=-1)       # (T, B, 2D)
        return comb.reshape(T * B, 2 * D).astype(bf16)

    topic_comb = seq_major_comb(topic_embeddings, Tt, Dt)
    text_comb = seq_major_comb(text_embeddings, Tx, Dx)

    # per-step 0/1 validity masks, [fwd H lanes | bwd H lanes], hoisted out of the recurrence.
    def build_mask(lengths, T):
        steps = jnp.arange(T, dtype=jnp.int32).reshape(T, 1, 1)
        ln = lengths.astype(jnp.int32).reshape(1, B, 1)
        fwd = jnp.broadcast_to(steps < ln, (T, B, H))            # t = s valid
        bwd = jnp.broadcast_to(steps >= (T - ln), (T, B, H))     # t = T-1-s valid
        return jnp.concatenate([fwd, bwd], axis=-1).astype(f32).reshape(T * B, 2 * H)

    topic_mask = build_mask(topic_length, Tt)
    text_mask = build_mask(text_length, Tx)

    # packed weights (bf16 MXU operands; biases stay f32 and are folded post-matmul)
    tp_wih = _pack_input_w(params["topic_wih"][0], params["topic_wih"][1], H).astype(bf16)
    tp_whh = _pack_hidden_w(params["topic_whh"][0], params["topic_whh"][1], H).astype(bf16)
    tp_b = _pack_gate_cols(params["topic_b"][0], params["topic_b"][1], H).astype(f32)
    tx_wih = _pack_input_w(params["text_wih"][0], params["text_wih"][1], H).astype(bf16)
    tx_whh = _pack_hidden_w(params["text_whh"][0], params["text_whh"][1], H).astype(bf16)
    tx_b = _pack_gate_cols(params["text_b"][0], params["text_b"][1], H).astype(f32)

    # lane-padded prediction head: zero weight columns + -1e30 bias -> full-lane softmax
    lanes = max(128, ((n_out + 127) // 128) * 128)
    pred_w = jnp.zeros((2 * H, lanes), f32).at[:, :n_out].set(params["pred_w"].astype(f32))
    pred_b = jnp.full((1, lanes), -1e30, f32).at[:, :n_out].set(
        params["pred_b"].reshape(1, -1).astype(f32))

    vmem = pl.BlockSpec(memory_space=pltpu.MemorySpace.VMEM)
    inputs = (topic_comb, text_comb, topic_mask, text_mask,
              tp_wih, tp_whh, tp_b, tx_wih, tx_whh, tx_b,
              pred_w, pred_b, clf1_pred.astype(f32), clf2_pred.astype(f32))

    return pl.pallas_call(
        functools.partial(ensemble_kernel, H=H, Tt=Tt, Tx=Tx, B=B, out_dim=out_dim),
        out_shape=jax.ShapeDtypeStruct((B, out_dim), jnp.float32),
        in_specs=[vmem] * len(inputs),
        out_specs=vmem,
        scratch_shapes=[pltpu.VMEM((Tt * B, 8 * H), jnp.float32),   # topic input projection
                        pltpu.VMEM((Tx * B, 8 * H), jnp.float32)],  # text  input projection
    )(*inputs)


# ----------------------------------------------------------------------------
# Pure-JAX reference (same math, all-f32) for a sanity check
# ----------------------------------------------------------------------------
def _ref_scan(emb_tbd, lengths, wih, whh, b, h0, c0, reverse):
    T = emb_tbd.shape[0]
    H = whh.shape[0]

    def step(s, carry):
        h, c = carry
        t = (T - 1 - s) if reverse else s
        x = emb_tbd[t]
        gates = x @ wih + h @ whh + b
        i = jax.nn.sigmoid(gates[:, :H])
        f = jax.nn.sigmoid(gates[:, H:2 * H])
        g = jnp.tanh(gates[:, 2 * H:3 * H])
        o = jax.nn.sigmoid(gates[:, 3 * H:])
        c_new = f * c + i * g
        h_new = o * jnp.tanh(c_new)
        valid = t < lengths
        return (jnp.where(valid, h_new, h), jnp.where(valid, c_new, c))

    return lax.fori_loop(0, T, step, (h0, c0))


def ensemble_reference(params, text_embeddings, text_length, topic_embeddings,
                       topic_length, clf1_pred, clf2_pred):
    B, Tx, _ = text_embeddings.shape
    _, Tt, _ = topic_embeddings.shape
    H = params["hidden_dim"]
    out_dim = params["output_dim"]
    text = jnp.transpose(text_embeddings, (1, 0, 2)).astype(jnp.float32)
    topic = jnp.transpose(topic_embeddings, (1, 0, 2)).astype(jnp.float32)
    tlen = text_length.astype(jnp.int32).reshape(B, 1)
    plen = topic_length.astype(jnp.int32).reshape(B, 1)
    z = jnp.zeros((B, H), jnp.float32)
    h_tf, c_tf = _ref_scan(topic, plen, params["topic_wih"][0], params["topic_whh"][0],
                           params["topic_b"][0], z, z, False)
    h_tb, c_tb = _ref_scan(topic, plen, params["topic_wih"][1], params["topic_whh"][1],
                           params["topic_b"][1], z, z, True)
    h_xf, _ = _ref_scan(text, tlen, params["text_wih"][0], params["text_whh"][0],
                        params["text_b"][0], h_tf, c_tf, False)
    h_xb, _ = _ref_scan(text, tlen, params["text_wih"][1], params["text_whh"][1],
                        params["text_b"][1], h_tb, c_tb, True)
    combo = jnp.concatenate([h_xf, h_xb], axis=1)
    logits = combo @ params["pred_w"] + params["pred_b"]
    gating = jax.nn.softmax(logits, axis=-1).reshape(B, 2, out_dim)
    clf = jnp.stack([clf1_pred, clf2_pred], axis=1).astype(jnp.float32)
    return (clf * gating).sum(axis=1)


# ----------------------------------------------------------------------------
def _init_dir_lstm(key, d_in, h):
    k1, k2, k3 = jax.random.split(key, 3)
    return (0.1 * jax.random.normal(k1, (d_in, 4 * h), jnp.float32),
            0.1 * jax.random.normal(k2, (h, 4 * h), jnp.float32),
            0.1 * jax.random.normal(k3, (1, 4 * h), jnp.float32))


def _init_bilstm(key, d_in, h):
    kf, kb = jax.random.split(key)
    wf, uf, bf = _init_dir_lstm(kf, d_in, h)
    wb, ub, bb = _init_dir_lstm(kb, d_in, h)
    return (jnp.stack([wf, wb]),      # (2, d_in, 4H)
            jnp.stack([uf, ub]),      # (2, H, 4H)
            jnp.stack([bf, bb]))      # (2, 1, 4H)


if __name__ == "__main__":
    B, Tx, Tt = 2, 8, 4            # batch, text seq, topic seq
    Dx, Dt, H = 32, 32, 32         # text/topic input dims, lstm hidden dim (8H = 256 lanes)
    num_labels = 3
    out_dim = num_labels           # output_dim = 3 (num_labels != 2)
    n_clfs = 2

    root = jax.random.PRNGKey(0)
    keys = jax.random.split(root, 10)

    tp_wih, tp_whh, tp_b = _init_bilstm(keys[0], Dt, H)
    tx_wih, tx_whh, tx_b = _init_bilstm(keys[1], Dx, H)

    params = {
        "hidden_dim": H,
        "output_dim": out_dim,
        "topic_wih": tp_wih, "topic_whh": tp_whh, "topic_b": tp_b,
        "text_wih": tx_wih, "text_whh": tx_whh, "text_b": tx_b,
        # gating PredictionLayer: Linear(2H -> n_clfs * output_dim)
        "pred_w": 0.1 * jax.random.normal(keys[2], (2 * H, n_clfs * out_dim), jnp.float32),
        "pred_b": 0.1 * jax.random.normal(keys[3], (n_clfs * out_dim,), jnp.float32),
    }

    text_embeddings = jax.random.normal(keys[4], (B, Tx, Dx), jnp.float32)
    topic_embeddings = jax.random.normal(keys[5], (B, Tt, Dt), jnp.float32)
    text_length = jnp.array([Tx, Tx - 2], jnp.int32)
    topic_length = jnp.array([Tt, Tt - 1], jnp.int32)
    clf1_pred = jax.nn.softmax(jax.random.normal(keys[6], (B, out_dim), jnp.float32), -1)
    clf2_pred = jax.nn.softmax(jax.random.normal(keys[7], (B, out_dim), jnp.float32), -1)

    y = ensemble_forward(params, text_embeddings, text_length, topic_embeddings,
                         topic_length, clf1_pred, clf2_pred)
    y = jax.block_until_ready(y)

    y_ref = ensemble_reference(params, text_embeddings, text_length, topic_embeddings,
                               topic_length, clf1_pred, clf2_pred)
    y_ref = jax.block_until_ready(y_ref)

    assert y.shape == (B, out_dim)
    assert jnp.all(jnp.isfinite(y))
    # bf16 MXU operands + approx reciprocal introduce ~1e-3-level differences vs the f32 ref.
    assert jnp.allclose(y, y_ref, atol=2e-2, rtol=2e-2)
    print("KERNEL_OK")
</pallas_src>

<mosaic_0001>
module attributes {stable_mosaic.version = 11 : i64} {
  func.func @ensemble_kernel(%arg0: memref<8x64xbf16, #tpu.memory_space<vmem>>, %arg1: memref<16x64xbf16, #tpu.memory_space<vmem>>, %arg2: memref<8x64xf32, #tpu.memory_space<vmem>>, %arg3: memref<16x64xf32, #tpu.memory_space<vmem>>, %arg4: memref<64x256xbf16, #tpu.memory_space<vmem>>, %arg5: memref<64x256xbf16, #tpu.memory_space<vmem>>, %arg6: memref<1x256xf32, #tpu.memory_space<vmem>>, %arg7: memref<64x256xbf16, #tpu.memory_space<vmem>>, %arg8: memref<64x256xbf16, #tpu.memory_space<vmem>>, %arg9: memref<1x256xf32, #tpu.memory_space<vmem>>, %arg10: memref<64x128xf32, #tpu.memory_space<vmem>>, %arg11: memref<1x128xf32, #tpu.memory_space<vmem>>, %arg12: memref<2x3xf32, #tpu.memory_space<vmem>>, %arg13: memref<2x3xf32, #tpu.memory_space<vmem>>, %arg14: memref<2x3xf32, #tpu.memory_space<vmem>>, %arg15: memref<8x256xf32, #tpu.memory_space<vmem>>, %arg16: memref<16x256xf32, #tpu.memory_space<vmem>>) attributes {dimension_semantics = [], scalar_prefetch = 0 : i64, scratch_operands = 2 : i64, tpu.core_type = #tpu.core_type<tc>} {
    %c0 = arith.constant 0 : index
    %c0_0 = arith.constant 0 : index
    %0 = vector.load %arg0[%c0, %c0_0] : memref<8x64xbf16, #tpu.memory_space<vmem>>, vector<8x64xbf16>
    %c0_1 = arith.constant 0 : index
    %c0_2 = arith.constant 0 : index
    %1 = vector.load %arg4[%c0_1, %c0_2] : memref<64x256xbf16, #tpu.memory_space<vmem>>, vector<64x256xbf16>
    %cst = arith.constant dense<0.000000e+00> : vector<8x256xf32>
    %2 = tpu.matmul %0, %1, %cst {dimension_numbers = #tpu.dot_dimension_numbers<[1], [0], [0], [1], [0, 0, 1, 1], [], []>} : vector<8x64xbf16>, vector<64x256xbf16>, vector<8x256xf32> -> vector<8x256xf32>
    %c0_3 = arith.constant 0 : index
    %c0_4 = arith.constant 0 : index
    %3 = vector.load %arg6[%c0_3, %c0_4] : memref<1x256xf32, #tpu.memory_space<vmem>>, vector<1x256xf32>
    %4 = vector.broadcast %3 : vector<1x256xf32> to vector<8x256xf32>
    %5 = arith.addf %2, %4 : vector<8x256xf32>
    %c0_5 = arith.constant 0 : index
    %c0_6 = arith.constant 0 : index
    %6 = vector.load %arg15[%c0_5, %c0_6] : memref<8x256xf32, #tpu.memory_space<vmem>>, vector<8x256xf32>
    tpu.vector_store %arg15[%c0_5, %c0_6], %5 {strides = array<i32>} : memref<8x256xf32, #tpu.memory_space<vmem>>, vector<8x256xf32>,
    %c0_7 = arith.constant 0 : index
    %c0_8 = arith.constant 0 : index
    %7 = vector.load %arg1[%c0_7, %c0_8] : memref<16x64xbf16, #tpu.memory_space<vmem>>, vector<16x64xbf16>
    %c0_9 = arith.constant 0 : index
    %c0_10 = arith.constant 0 : index
    %8 = vector.load %arg7[%c0_9, %c0_10] : memref<64x256xbf16, #tpu.memory_space<vmem>>, vector<64x256xbf16>
    %cst_11 = arith.constant dense<0.000000e+00> : vector<16x256xf32>
    %9 = tpu.matmul %7, %8, %cst_11 {dimension_numbers = #tpu.dot_dimension_numbers<[1], [0], [0], [1], [0, 0, 1, 1], [], []>} : vector<16x64xbf16>, vector<64x256xbf16>, vector<16x256xf32> -> vector<16x256xf32>
    %c0_12 = arith.constant 0 : index
    %c0_13 = arith.constant 0 : index
    %10 = vector.load %arg9[%c0_12, %c0_13] : memref<1x256xf32, #tpu.memory_space<vmem>>, vector<1x256xf32>
    %11 = vector.broadcast %10 : vector<1x256xf32> to vector<16x256xf32>
    %12 = arith.addf %9, %11 : vector<16x256xf32>
    %c0_14 = arith.constant 0 : index
    %c0_15 = arith.constant 0 : index
    %13 = vector.load %arg16[%c0_14, %c0_15] : memref<16x256xf32, #tpu.memory_space<vmem>>, vector<16x256xf32>
    tpu.vector_store %arg16[%c0_14, %c0_15], %12 {strides = array<i32>} : memref<16x256xf32, #tpu.memory_space<vmem>>, vector<16x256xf32>,
    %cst_16 = arith.constant 0.000000e+00 : f32
    %14 = vector.broadcast %cst_16 : f32 to vector<2x64xf32>
    %c0_17 = arith.constant 0 : index
    %c0_18 = arith.constant 0 : index
    %15 = vector.load %arg5[%c0_17, %c0_18] : memref<64x256xbf16, #tpu.memory_space<vmem>>, vector<64x256xbf16>
    %c0_i32 = arith.constant 0 : i32
    %c2_i32 = arith.constant 2 : i32
    %16 = arith.muli %c0_i32, %c2_i32 : i32
    %17 = arith.index_cast %16 : i32 to index
    %c0_19 = arith.constant 0 : index
    %18 = vector.load %arg15[%17, %c0_19] : memref<8x256xf32, #tpu.memory_space<vmem>>, vector<2x256xf32>
    %19 = arith.truncf %14 : vector<2x64xf32> to vector<2x64xbf16>
    %cst_20 = arith.constant dense<0.000000e+00> : vector<2x256xf32>
    %20 = tpu.matmul %19, %15, %cst_20 {dimension_numbers = #tpu.dot_dimension_numbers<[1], [0], [0], [1], [0, 0, 1, 1], [], []>} : vector<2x64xbf16>, vector<64x256xbf16>, vector<2x256xf32> -> vector<2x256xf32>
    %21 = arith.addf %18, %20 : vector<2x256xf32>
    %22 = arith.negf %21 : vector<2x256xf32>
    %23 = math.exp %22 : vector<2x256xf32>
    %cst_21 = arith.constant 1.000000e+00 : f32
    %24 = vector.broadcast %cst_21 : f32 to vector<2x256xf32>
    %25 = arith.addf %24, %23 : vector<2x256xf32>
    %26 = arith.divf %24, %25 : vector<2x256xf32>
    %27 = math.tanh %21 : vector<2x256xf32>
    %28 = vector.extract_strided_slice %26 {offsets = [0, 0], sizes = [2, 64], strides = [1, 1]} : vector<2x256xf32> to vector<2x64xf32>
    %29 = vector.extract_strided_slice %26 {offsets = [0, 64], sizes = [2, 64], strides = [1, 1]} : vector<2x256xf32> to vector<2x64xf32>
    %30 = vector.extract_strided_slice %27 {offsets = [0, 128], sizes = [2, 64], strides = [1, 1]} : vector<2x256xf32> to vector<2x64xf32>
    %31 = vector.extract_strided_slice %26 {offsets = [0, 192], sizes = [2, 64], strides = [1, 1]} : vector<2x256xf32> to vector<2x64xf32>
    %32 = arith.mulf %29, %14 : vector<2x64xf32>
    %33 = arith.mulf %28, %30 : vector<2x64xf32>
    %34 = arith.addf %32, %33 : vector<2x64xf32>
    %35 = math.tanh %34 : vector<2x64xf32>
    %36 = arith.mulf %31, %35 : vector<2x64xf32>
    %c2_i32_22 = arith.constant 2 : i32
    %37 = arith.muli %c0_i32, %c2_i32_22 : i32
    %38 = arith.index_cast %37 : i32 to index
    %c0_23 = arith.constant 0 : index
    %39 = vector.load %arg2[%38, %c0_23] : memref<8x64xf32, #tpu.memory_space<vmem>>, vector<2x64xf32>
    %40 = arith.subf %36, %14 : vector<2x64xf32>
    %41 = arith.mulf %39, %40 : vector<2x64xf32>
    %42 = arith.addf %14, %41 : vector<2x64xf32>
    %43 = arith.subf %34, %14 : vector<2x64xf32>
    %44 = arith.mulf %39, %43 : vector<2x64xf32>
    %45 = arith.addf %14, %44 : vector<2x64xf32>
    %c1_i32 = arith.constant 1 : i32
    %c2_i32_24 = arith.constant 2 : i32
    %46 = arith.muli %c1_i32, %c2_i32_24 : i32
    %47 = arith.index_cast %46 : i32 to index
    %c0_25 = arith.constant 0 : index
    %48 = vector.load %arg15[%47, %c0_25] : memref<8x256xf32, #tpu.memory_space<vmem>>, vector<2x256xf32>
    %49 = arith.truncf %42 : vector<2x64xf32> to vector<2x64xbf16>
    %cst_26 = arith.constant dense<0.000000e+00> : vector<2x256xf32>
    %50 = tpu.matmul %49, %15, %cst_26 {dimension_numbers = #tpu.dot_dimension_numbers<[1], [0], [0], [1], [0, 0, 1, 1], [], []>} : vector<2x64xbf16>, vector<64x256xbf16>, vector<2x256xf32> -> vector<2x256xf32>
    %51 = arith.addf %48, %50 : vector<2x256xf32>
    %52 = arith.negf %51 : vector<2x256xf32>
    %53 = math.exp %52 : vector<2x256xf32>
    %cst_27 = arith.constant 1.000000e+00 : f32
    %54 = vector.broadcast %cst_27 : f32 to vector<2x256xf32>
    %55 = arith.addf %54, %53 : vector<2x256xf32>
    %56 = arith.divf %54, %55 : vector<2x256xf32>
    %57 = math.tanh %51 : vector<2x256xf32>
    %58 = vector.extract_strided_slice %56 {offsets = [0, 0], sizes = [2, 64], strides = [1, 1]} : vector<2x256xf32> to vector<2x64xf32>
    %59 = vector.extract_strided_slice %56 {offsets = [0, 64], sizes = [2, 64], strides = [1, 1]} : vector<2x256xf32> to vector<2x64xf32>
    %60 = vector.extract_strided_slice %57 {offsets = [0, 128], sizes = [2, 64], strides = [1, 1]} : vector<2x256xf32> to vector<2x64xf32>
    %61 = vector.extract_strided_slice %56 {offsets = [0, 192], sizes = [2, 64], strides = [1, 1]} : vector<2x256xf32> to vector<2x64xf32>
    %62 = arith.mulf %59, %45 : vector<2x64xf32>
    %63 = arith.mulf %58, %60 : vector<2x64xf32>
    %64 = arith.addf %62, %63 : vector<2x64xf32>
    %65 = math.tanh %64 : vector<2x64xf32>
    %66 = arith.mulf %61, %65 : vector<2x64xf32>
    %c2_i32_28 = arith.constant 2 : i32
    %67 = arith.muli %c1_i32, %c2_i32_28 : i32
    %68 = arith.index_cast %67 : i32 to index
    %c0_29 = arith.constant 0 : index
    %69 = vector.load %arg2[%68, %c0_29] : memref<8x64xf32, #tpu.memory_space<vmem>>, vector<2x64xf32>
    %70 = arith.subf %66, %42 : vector<2x64xf32>
    %71 = arith.mulf %69, %70 : vector<2x64xf32>
    %72 = arith.addf %42, %71 : vector<2x64xf32>
    %73 = arith.subf %64, %45 : vector<2x64xf32>
    %74 = arith.mulf %69, %73 : vector<2x64xf32>
    %75 = arith.addf %45, %74 : vector<2x64xf32>
    %c2_i32_30 = arith.constant 2 : i32
    %c2_i32_31 = arith.constant 2 : i32
    %76 = arith.muli %c2_i32_30, %c2_i32_31 : i32
    %77 = arith.index_cast %76 : i32 to index
    %c0_32 = arith.constant 0 : index
    %78 = vector.load %arg15[%77, %c0_32] : memref<8x256xf32, #tpu.memory_space<vmem>>, vector<2x256xf32>
    %79 = arith.truncf %72 : vector<2x64xf32> to vector<2x64xbf16>
    %cst_33 = arith.constant dense<0.000000e+00> : vector<2x256xf32>
    %80 = tpu.matmul %79, %15, %cst_33 {dimension_numbers = #tpu.dot_dimension_numbers<[1], [0], [0], [1], [0, 0, 1, 1], [], []>} : vector<2x64xbf16>, vector<64x256xbf16>, vector<2x256xf32> -> vector<2x256xf32>
    %81 = arith.addf %78, %80 : vector<2x256xf32>
    %82 = arith.negf %81 : vector<2x256xf32>
    %83 = math.exp %82 : vector<2x256xf32>
    %cst_34 = arith.constant 1.000000e+00 : f32
    %84 = vector.broadcast %cst_34 : f32 to vector<2x256xf32>
    %85 = arith.addf %84, %83 : vector<2x256xf32>
    %86 = arith.divf %84, %85 : vector<2x256xf32>
    %87 = math.tanh %81 : vector<2x256xf32>
    %88 = vector.extract_strided_slice %86 {offsets = [0, 0], sizes = [2, 64], strides = [1, 1]} : vector<2x256xf32> to vector<2x64xf32>
    %89 = vector.extract_strided_slice %86 {offsets = [0, 64], sizes = [2, 64], strides = [1, 1]} : vector<2x256xf32> to vector<2x64xf32>
    %90 = vector.extract_strided_slice %87 {offsets = [0, 128], sizes = [2, 64], strides = [1, 1]} : vector<2x256xf32> to vector<2x64xf32>
    %91 = vector.extract_strided_slice %86 {offsets = [0, 192], sizes = [2, 64], strides = [1, 1]} : vector<2x256xf32> to vector<2x64xf32>
    %92 = arith.mulf %89, %75 : vector<2x64xf32>
    %93 = arith.mulf %88, %90 : vector<2x64xf32>
    %94 = arith.addf %92, %93 : vector<2x64xf32>
    %95 = math.tanh %94 : vector<2x64xf32>
    %96 = arith.mulf %91, %95 : vector<2x64xf32>
    %c2_i32_35 = arith.constant 2 : i32
    %97 = arith.muli %c2_i32_30, %c2_i32_35 : i32
    %98 = arith.index_cast %97 : i32 to index
    %c0_36 = arith.constant 0 : index
    %99 = vector.load %arg2[%98, %c0_36] : memref<8x64xf32, #tpu.memory_space<vmem>>, vector<2x64xf32>
    %100 = arith.subf %96, %72 : vector<2x64xf32>
    %101 = arith.mulf %99, %100 : vector<2x64xf32>
    %102 = arith.addf %72, %101 : vector<2x64xf32>
    %103 = arith.subf %94, %75 : vector<2x64xf32>
    %104 = arith.mulf %99, %103 : vector<2x64xf32>
    %105 = arith.addf %75, %104 : vector<2x64xf32>
    %c3_i32 = arith.constant 3 : i32
    %c2_i32_37 = arith.constant 2 : i32
    %106 = arith.muli %c3_i32, %c2_i32_37 : i32
    %107 = arith.index_cast %106 : i32 to index
    %c0_38 = arith.constant 0 : index
    %108 = vector.load %arg15[%107, %c0_38] : memref<8x256xf32, #tpu.memory_space<vmem>>, vector<2x256xf32>
    %109 = arith.truncf %102 : vector<2x64xf32> to vector<2x64xbf16>
    %cst_39 = arith.constant dense<0.000000e+00> : vector<2x256xf32>
    %110 = tpu.matmul %109, %15, %cst_39 {dimension_numbers = #tpu.dot_dimension_numbers<[1], [0], [0], [1], [0, 0, 1, 1], [], []>} : vector<2x64xbf16>, vector<64x256xbf16>, vector<2x256xf32> -> vector<2x256xf32>
    %111 = arith.addf %108, %110 : vector<2x256xf32>
    %112 = arith.negf %111 : vector<2x256xf32>
    %113 = math.exp %112 : vector<2x256xf32>
    %cst_40 = arith.constant 1.000000e+00 : f32
    %114 = vector.broadcast %cst_40 : f32 to vector<2x256xf32>
    %115 = arith.addf %114, %113 : vector<2x256xf32>
    %116 = arith.divf %114, %115 : vector<2x256xf32>
    %117 = math.tanh %111 : vector<2x256xf32>
    %118 = vector.extract_strided_slice %116 {offsets = [0, 0], sizes = [2, 64], strides = [1, 1]} : vector<2x256xf32> to vector<2x64xf32>
    %119 = vector.extract_strided_slice %116 {offsets = [0, 64], sizes = [2, 64], strides = [1, 1]} : vector<2x256xf32> to vector<2x64xf32>
    %120 = vector.extract_strided_slice %117 {offsets = [0, 128], sizes = [2, 64], strides = [1, 1]} : vector<2x256xf32> to vector<2x64xf32>
    %121 = vector.extract_strided_slice %116 {offsets = [0, 192], sizes = [2, 64], strides = [1, 1]} : vector<2x256xf32> to vector<2x64xf32>
    %122 = arith.mulf %119, %105 : vector<2x64xf32>
    %123 = arith.mulf %118, %120 : vector<2x64xf32>
    %124 = arith.addf %122, %123 : vector<2x64xf32>
    %125 = math.tanh %124 : vector<2x64xf32>
    %126 = arith.mulf %121, %125 : vector<2x64xf32>
    %c2_i32_41 = arith.constant 2 : i32
    %127 = arith.muli %c3_i32, %c2_i32_41 : i32
    %128 = arith.index_cast %127 : i32 to index
    %c0_42 = arith.constant 0 : index
    %129 = vector.load %arg2[%128, %c0_42] : memref<8x64xf32, #tpu.memory_space<vmem>>, vector<2x64xf32>
    %130 = arith.subf %126, %102 : vector<2x64xf32>
    %131 = arith.mulf %129, %130 : vector<2x64xf32>
    %132 = arith.addf %102, %131 : vector<2x64xf32>
    %133 = arith.subf %124, %105 : vector<2x64xf32>
    %134 = arith.mulf %129, %133 : vector<2x64xf32>
    %135 = arith.addf %105, %134 : vector<2x64xf32>
    %c4_i32 = arith.constant 4 : i32
    %c0_43 = arith.constant 0 : index
    %c0_44 = arith.constant 0 : index
    %136 = vector.load %arg8[%c0_43, %c0_44] : memref<64x256xbf16, #tpu.memory_space<vmem>>, vector<64x256xbf16>
    %c0_i32_45 = arith.constant 0 : i32
    %c2_i32_46 = arith.constant 2 : i32
    %137 = arith.muli %c0_i32_45, %c2_i32_46 : i32
    %138 = arith.index_cast %137 : i32 to index
    %c0_47 = arith.constant 0 : index
    %139 = vector.load %arg16[%138, %c0_47] : memref<16x256xf32, #tpu.memory_space<vmem>>, vector<2x256xf32>
    %140 = arith.truncf %132 : vector<2x64xf32> to vector<2x64xbf16>
    %cst_48 = arith.constant dense<0.000000e+00> : vector<2x256xf32>
    %141 = tpu.matmul %140, %136, %cst_48 {dimension_numbers = #tpu.dot_dimension_numbers<[1], [0], [0], [1], [0, 0, 1, 1], [], []>} : vector<2x64xbf16>, vector<64x256xbf16>, vector<2x256xf32> -> vector<2x256xf32>
    %142 = arith.addf %139, %141 : vector<2x256xf32>
    %143 = arith.negf %142 : vector<2x256xf32>
    %144 = math.exp %143 : vector<2x256xf32>
    %cst_49 = arith.constant 1.000000e+00 : f32
    %145 = vector.broadcast %cst_49 : f32 to vector<2x256xf32>
    %146 = arith.addf %145, %144 : vector<2x256xf32>
    %147 = arith.divf %145, %146 : vector<2x256xf32>
    %148 = math.tanh %142 : vector<2x256xf32>
    %149 = vector.extract_strided_slice %147 {offsets = [0, 0], sizes = [2, 64], strides = [1, 1]} : vector<2x256xf32> to vector<2x64xf32>
    %150 = vector.extract_strided_slice %147 {offsets = [0, 64], sizes = [2, 64], strides = [1, 1]} : vector<2x256xf32> to vector<2x64xf32>
    %151 = vector.extract_strided_slice %148 {offsets = [0, 128], sizes = [2, 64], strides = [1, 1]} : vector<2x256xf32> to vector<2x64xf32>
    %152 = vector.extract_strided_slice %147 {offsets = [0, 192], sizes = [2, 64], strides = [1, 1]} : vector<2x256xf32> to vector<2x64xf32>
    %153 = arith.mulf %150, %135 : vector<2x64xf32>
    %154 = arith.mulf %149, %151 : vector<2x64xf32>
    %155 = arith.addf %153, %154 : vector<2x64xf32>
    %156 = math.tanh %155 : vector<2x64xf32>
    %157 = arith.mulf %152, %156 : vector<2x64xf32>
    %c2_i32_50 = arith.constant 2 : i32
    %158 = arith.muli %c0_i32_45, %c2_i32_50 : i32
    %159 = arith.index_cast %158 : i32 to index
    %c0_51 = arith.constant 0 : index
    %160 = vector.load %arg3[%159, %c0_51] : memref<16x64xf32, #tpu.memory_space<vmem>>, vector<2x64xf32>
    %161 = arith.subf %157, %132 : vector<2x64xf32>
    %162 = arith.mulf %160, %161 : vector<2x64xf32>
    %163 = arith.addf %132, %162 : vector<2x64xf32>
    %164 = arith.subf %155, %135 : vector<2x64xf32>
    %165 = arith.mulf %160, %164 : vector<2x64xf32>
    %166 = arith.addf %135, %165 : vector<2x64xf32>
    %c1_i32_52 = arith.constant 1 : i32
    %c2_i32_53 = arith.constant 2 : i32
    %167 = arith.muli %c1_i32_52, %c2_i32_53 : i32
    %168 = arith.index_cast %167 : i32 to index
    %c0_54 = arith.constant 0 : index
    %169 = vector.load %arg16[%168, %c0_54] : memref<16x256xf32, #tpu.memory_space<vmem>>, vector<2x256xf32>
    %170 = arith.truncf %163 : vector<2x64xf32> to vector<2x64xbf16>
    %cst_55 = arith.constant dense<0.000000e+00> : vector<2x256xf32>
    %171 = tpu.matmul %170, %136, %cst_55 {dimension_numbers = #tpu.dot_dimension_numbers<[1], [0], [0], [1], [0, 0, 1, 1], [], []>} : vector<2x64xbf16>, vector<64x256xbf16>, vector<2x256xf32> -> vector<2x256xf32>
    %172 = arith.addf %169, %171 : vector<2x256xf32>
    %173 = arith.negf %172 : vector<2x256xf32>
    %174 = math.exp %173 : vector<2x256xf32>
    %cst_56 = arith.constant 1.000000e+00 : f32
    %175 = vector.broadcast %cst_56 : f32 to vector<2x256xf32>
    %176 = arith.addf %175, %174 : vector<2x256xf32>
    %177 = arith.divf %175, %176 : vector<2x256xf32>
    %178 = math.tanh %172 : vector<2x256xf32>
    %179 = vector.extract_strided_slice %177 {offsets = [0, 0], sizes = [2, 64], strides = [1, 1]} : vector<2x256xf32> to vector<2x64xf32>
    %180 = vector.extract_strided_slice %177 {offsets = [0, 64], sizes = [2, 64], strides = [1, 1]} : vector<2x256xf32> to vector<2x64xf32>
    %181 = vector.extract_strided_slice %178 {offsets = [0, 128], sizes = [2, 64], strides = [1, 1]} : vector<2x256xf32> to vector<2x64xf32>
    %182 = vector.extract_strided_slice %177 {offsets = [0, 192], sizes = [2, 64], strides = [1, 1]} : vector<2x256xf32> to vector<2x64xf32>
    %183 = arith.mulf %180, %166 : vector<2x64xf32>
    %184 = arith.mulf %179, %181 : vector<2x64xf32>
    %185 = arith.addf %183, %184 : vector<2x64xf32>
    %186 = math.tanh %185 : vector<2x64xf32>
    %187 = arith.mulf %182, %186 : vector<2x64xf32>
    %c2_i32_57 = arith.constant 2 : i32
    %188 = arith.muli %c1_i32_52, %c2_i32_57 : i32
    %189 = arith.index_cast %188 : i32 to index
    %c0_58 = arith.constant 0 : index
    %190 = vector.load %arg3[%189, %c0_58] : memref<16x64xf32, #tpu.memory_space<vmem>>, vector<2x64xf32>
    %191 = arith.subf %187, %163 : vector<2x64xf32>
    %192 = arith.mulf %190, %191 : vector<2x64xf32>
    %193 = arith.addf %163, %192 : vector<2x64xf32>
    %194 = arith.subf %185, %166 : vector<2x64xf32>
    %195 = arith.mulf %190, %194 : vector<2x64xf32>
    %196 = arith.addf %166, %195 : vector<2x64xf32>
    %c2_i32_59 = arith.constant 2 : i32
    %c2_i32_60 = arith.constant 2 : i32
    %197 = arith.muli %c2_i32_59, %c2_i32_60 : i32
    %198 = arith.index_cast %197 : i32 to index
    %c0_61 = arith.constant 0 : index
    %199 = vector.load %arg16[%198, %c0_61] : memref<16x256xf32, #tpu.memory_space<vmem>>, vector<2x256xf32>
    %200 = arith.truncf %193 : vector<2x64xf32> to vector<2x64xbf16>
    %cst_62 = arith.constant dense<0.000000e+00> : vector<2x256xf32>
    %201 = tpu.matmul %200, %136, %cst_62 {dimension_numbers = #tpu.dot_dimension_numbers<[1], [0], [0], [1], [0, 0, 1, 1], [], []>} : vector<2x64xbf16>, vector<64x256xbf16>, vector<2x256xf32> -> vector<2x256xf32>
    %202 = arith.addf %199, %201 : vector<2x256xf32>
    %203 = arith.negf %202 : vector<2x256xf32>
    %204 = math.exp %203 : vector<2x256xf32>
    %cst_63 = arith.constant 1.000000e+00 : f32
    %205 = vector.broadcast %cst_63 : f32 to vector<2x256xf32>
    %206 = arith.addf %205, %204 : vector<2x256xf32>
    %207 = arith.divf %205, %206 : vector<2x256xf32>
    %208 = math.tanh %202 : vector<2x256xf32>
    %209 = vector.extract_strided_slice %207 {offsets = [0, 0], sizes = [2, 64], strides = [1, 1]} : vector<2x256xf32> to vector<2x64xf32>
    %210 = vector.extract_strided_slice %207 {offsets = [0, 64], sizes = [2, 64], strides = [1, 1]} : vector<2x256xf32> to vector<2x64xf32>
    %211 = vector.extract_strided_slice %208 {offsets = [0, 128], sizes = [2, 64], strides = [1, 1]} : vector<2x256xf32> to vector<2x64xf32>
    %212 = vector.extract_strided_slice %207 {offsets = [0, 192], sizes = [2, 64], strides = [1, 1]} : vector<2x256xf32> to vector<2x64xf32>
    %213 = arith.mulf %210, %196 : vector<2x64xf32>
    %214 = arith.mulf %209, %211 : vector<2x64xf32>
    %215 = arith.addf %213, %214 : vector<2x64xf32>
    %216 = math.tanh %215 : vector<2x64xf32>
    %217 = arith.mulf %212, %216 : vector<2x64xf32>
    %c2_i32_64 = arith.constant 2 : i32
    %218 = arith.muli %c2_i32_59, %c2_i32_64 : i32
    %219 = arith.index_cast %218 : i32 to index
    %c0_65 = arith.constant 0 : index
    %220 = vector.load %arg3[%219, %c0_65] : memref<16x64xf32, #tpu.memory_space<vmem>>, vector<2x64xf32>
    %221 = arith.subf %217, %193 : vector<2x64xf32>
    %222 = arith.mulf %220, %221 : vector<2x64xf32>
    %223 = arith.addf %193, %222 : vector<2x64xf32>
    %224 = arith.subf %215, %196 : vector<2x64xf32>
    %225 = arith.mulf %220, %224 : vector<2x64xf32>
    %226 = arith.addf %196, %225 : vector<2x64xf32>
    %c3_i32_66 = arith.constant 3 : i32
    %c2_i32_67 = arith.constant 2 : i32
    %227 = arith.muli %c3_i32_66, %c2_i32_67 : i32
    %228 = arith.index_cast %227 : i32 to index
    %c0_68 = arith.constant 0 : index
    %229 = vector.load %arg16[%228, %c0_68] : memref<16x256xf32, #tpu.memory_space<vmem>>, vector<2x256xf32>
    %230 = arith.truncf %223 : vector<2x64xf32> to vector<2x64xbf16>
    %cst_69 = arith.constant dense<0.000000e+00> : vector<2x256xf32>
    %231 = tpu.matmul %230, %136, %cst_69 {dimension_numbers = #tpu.dot_dimension_numbers<[1], [0], [0], [1], [0, 0, 1, 1], [], []>} : vector<2x64xbf16>, vector<64x256xbf16>, vector<2x256xf32> -> vector<2x256xf32>
    %232 = arith.addf %229, %231 : vector<2x256xf32>
    %233 = arith.negf %232 : vector<2x256xf32>
    %234 = math.exp %233 : vector<2x256xf32>
    %cst_70 = arith.constant 1.000000e+00 : f32
    %235 = vector.broadcast %cst_70 : f32 to vector<2x256xf32>
    %236 = arith.addf %235, %234 : vector<2x256xf32>
    %237 = arith.divf %235, %236 : vector<2x256xf32>
    %238 = math.tanh %232 : vector<2x256xf32>
    %239 = vector.extract_strided_slice %237 {offsets = [0, 0], sizes = [2, 64], strides = [1, 1]} : vector<2x256xf32> to vector<2x64xf32>
    %240 = vector.extract_strided_slice %237 {offsets = [0, 64], sizes = [2, 64], strides = [1, 1]} : vector<2x256xf32> to vector<2x64xf32>
    %241 = vector.extract_strided_slice %238 {offsets = [0, 128], sizes = [2, 64], strides = [1, 1]} : vector<2x256xf32> to vector<2x64xf32>
    %242 = vector.extract_strided_slice %237 {offsets = [0, 192], sizes = [2, 64], strides = [1, 1]} : vector<2x256xf32> to vector<2x64xf32>
    %243 = arith.mulf %240, %226 : vector<2x64xf32>
    %244 = arith.mulf %239, %241 : vector<2x64xf32>
    %245 = arith.addf %243, %244 : vector<2x64xf32>
    %246 = math.tanh %245 : vector<2x64xf32>
    %247 = arith.mulf %242, %246 : vector<2x64xf32>
    %c2_i32_71 = arith.constant 2 : i32
    %248 = arith.muli %c3_i32_66, %c2_i32_71 : i32
    %249 = arith.index_cast %248 : i32 to index
    %c0_72 = arith.constant 0 : index
    %250 = vector.load %arg3[%249, %c0_72] : memref<16x64xf32, #tpu.memory_space<vmem>>, vector<2x64xf32>
    %251 = arith.subf %247, %223 : vector<2x64xf32>
    %252 = arith.mulf %250, %251 : vector<2x64xf32>
    %253 = arith.addf %223, %252 : vector<2x64xf32>
    %254 = arith.subf %245, %226 : vector<2x64xf32>
    %255 = arith.mulf %250, %254 : vector<2x64xf32>
    %256 = arith.addf %226, %255 : vector<2x64xf32>
    %c4_i32_73 = arith.constant 4 : i32
    %c2_i32_74 = arith.constant 2 : i32
    %257 = arith.muli %c4_i32_73, %c2_i32_74 : i32
    %258 = arith.index_cast %257 : i32 to index
    %c0_75 = arith.constant 0 : index
    %259 = vector.load %arg16[%258, %c0_75] : memref<16x256xf32, #tpu.memory_space<vmem>>, vector<2x256xf32>
    %260 = arith.truncf %253 : vector<2x64xf32> to vector<2x64xbf16>
    %cst_76 = arith.constant dense<0.000000e+00> : vector<2x256xf32>
    %261 = tpu.matmul %260, %136, %cst_76 {dimension_numbers = #tpu.dot_dimension_numbers<[1], [0], [0], [1], [0, 0, 1, 1], [], []>} : vector<2x64xbf16>, vector<64x256xbf16>, vector<2x256xf32> -> vector<2x256xf32>
    %262 = arith.addf %259, %261 : vector<2x256xf32>
    %263 = arith.negf %262 : vector<2x256xf32>
    %264 = math.exp %263 : vector<2x256xf32>
    %cst_77 = arith.constant 1.000000e+00 : f32
    %265 = vector.broadcast %cst_77 : f32 to vector<2x256xf32>
    %266 = arith.addf %265, %264 : vector<2x256xf32>
    %267 = arith.divf %265, %266 : vector<2x256xf32>
    %268 = math.tanh %262 : vector<2x256xf32>
    %269 = vector.extract_strided_slice %267 {offsets = [0, 0], sizes = [2, 64], strides = [1, 1]} : vector<2x256xf32> to vector<2x64xf32>
    %270 = vector.extract_strided_slice %267 {offsets = [0, 64], sizes = [2, 64], strides = [1, 1]} : vector<2x256xf32> to vector<2x64xf32>
    %271 = vector.extract_strided_slice %268 {offsets = [0, 128], sizes = [2, 64], strides = [1, 1]} : vector<2x256xf32> to vector<2x64xf32>
    %272 = vector.extract_strided_slice %267 {offsets = [0, 192], sizes = [2, 64], strides = [1, 1]} : vector<2x256xf32> to vector<2x64xf32>
    %273 = arith.mulf %270, %256 : vector<2x64xf32>
    %274 = arith.mulf %269, %271 : vector<2x64xf32>
    %275 = arith.addf %273, %274 : vector<2x64xf32>
    %276 = math.tanh %275 : vector<2x64xf32>
    %277 = arith.mulf %272, %276 : vector<2x64xf32>
    %c2_i32_78 = arith.constant 2 : i32
    %278 = arith.muli %c4_i32_73, %c2_i32_78 : i32
    %279 = arith.index_cast %278 : i32 to index
    %c0_79 = arith.constant 0 : index
    %280 = vector.load %arg3[%279, %c0_79] : memref<16x64xf32, #tpu.memory_space<vmem>>, vector<2x64xf32>
    %281 = arith.subf %277, %253 : vector<2x64xf32>
    %282 = arith.mulf %280, %281 : vector<2x64xf32>
    %283 = arith.addf %253, %282 : vector<2x64xf32>
    %284 = arith.subf %275, %256 : vector<2x64xf32>
    %285 = arith.mulf %280, %284 : vector<2x64xf32>
    %286 = arith.addf %256, %285 : vector<2x64xf32>
    %c5_i32 = arith.constant 5 : i32
    %c2_i32_80 = arith.constant 2 : i32
    %287 = arith.muli %c5_i32, %c2_i32_80 : i32
    %288 = arith.index_cast %287 : i32 to index
    %c0_81 = arith.constant 0 : index
    %289 = vector.load %arg16[%288, %c0_81] : memref<16x256xf32, #tpu.memory_space<vmem>>, vector<2x256xf32>
    %290 = arith.truncf %283 : vector<2x64xf32> to vector<2x64xbf16>
    %cst_82 = arith.constant dense<0.000000e+00> : vector<2x256xf32>
    %291 = tpu.matmul %290, %136, %cst_82 {dimension_numbers = #tpu.dot_dimension_numbers<[1], [0], [0], [1], [0, 0, 1, 1], [], []>} : vector<2x64xbf16>, vector<64x256xbf16>, vector<2x256xf32> -> vector<2x256xf32>
    %292 = arith.addf %289, %291 : vector<2x256xf32>
    %293 = arith.negf %292 : vector<2x256xf32>
    %294 = math.exp %293 : vector<2x256xf32>
    %cst_83 = arith.constant 1.000000e+00 : f32
    %295 = vector.broadcast %cst_83 : f32 to vector<2x256xf32>
    %296 = arith.addf %295, %294 : vector<2x256xf32>
    %297 = arith.divf %295, %296 : vector<2x256xf32>
    %298 = math.tanh %292 : vector<2x256xf32>
    %299 = vector.extract_strided_slice %297 {offsets = [0, 0], sizes = [2, 64], strides = [1, 1]} : vector<2x256xf32> to vector<2x64xf32>
    %300 = vector.extract_strided_slice %297 {offsets = [0, 64], sizes = [2, 64], strides = [1, 1]} : vector<2x256xf32> to vector<2x64xf32>
    %301 = vector.extract_strided_slice %298 {offsets = [0, 128], sizes = [2, 64], strides = [1, 1]} : vector<2x256xf32> to vector<2x64xf32>
    %302 = vector.extract_strided_slice %297 {offsets = [0, 192], sizes = [2, 64], strides = [1, 1]} : vector<2x256xf32> to vector<2x64xf32>
    %303 = arith.mulf %300, %286 : vector<2x64xf32>
    %304 = arith.mulf %299, %301 : vector<2x64xf32>
    %305 = arith.addf %303, %304 : vector<2x64xf32>
    %306 = math.tanh %305 : vector<2x64xf32>
    %307 = arith.mulf %302, %306 : vector<2x64xf32>
    %c2_i32_84 = arith.constant 2 : i32
    %308 = arith.muli %c5_i32, %c2_i32_84 : i32
    %309 = arith.index_cast %308 : i32 to index
    %c0_85 = arith.constant 0 : index
    %310 = vector.load %arg3[%309, %c0_85] : memref<16x64xf32, #tpu.memory_space<vmem>>, vector<2x64xf32>
    %311 = arith.subf %307, %283 : vector<2x64xf32>
    %312 = arith.mulf %310, %311 : vector<2x64xf32>
    %313 = arith.addf %283, %312 : vector<2x64xf32>
    %314 = arith.subf %305, %286 : vector<2x64xf32>
    %315 = arith.mulf %310, %314 : vector<2x64xf32>
    %316 = arith.addf %286, %315 : vector<2x64xf32>
    %c6_i32 = arith.constant 6 : i32
    %c2_i32_86 = arith.constant 2 : i32
    %317 = arith.muli %c6_i32, %c2_i32_86 : i32
    %318 = arith.index_cast %317 : i32 to index
    %c0_87 = arith.constant 0 : index
    %319 = vector.load %arg16[%318, %c0_87] : memref<16x256xf32, #tpu.memory_space<vmem>>, vector<2x256xf32>
    %320 = arith.truncf %313 : vector<2x64xf32> to vector<2x64xbf16>
    %cst_88 = arith.constant dense<0.000000e+00> : vector<2x256xf32>
    %321 = tpu.matmul %320, %136, %cst_88 {dimension_numbers = #tpu.dot_dimension_numbers<[1], [0], [0], [1], [0, 0, 1, 1], [], []>} : vector<2x64xbf16>, vector<64x256xbf16>, vector<2x256xf32> -> vector<2x256xf32>
    %322 = arith.addf %319, %321 : vector<2x256xf32>
    %323 = arith.negf %322 : vector<2x256xf32>
    %324 = math.exp %323 : vector<2x256xf32>
    %cst_89 = arith.constant 1.000000e+00 : f32
    %325 = vector.broadcast %cst_89 : f32 to vector<2x256xf32>
    %326 = arith.addf %325, %324 : vector<2x256xf32>
    %327 = arith.divf %325, %326 : vector<2x256xf32>
    %328 = math.tanh %322 : vector<2x256xf32>
    %329 = vector.extract_strided_slice %327 {offsets = [0, 0], sizes = [2, 64], strides = [1, 1]} : vector<2x256xf32> to vector<2x64xf32>
    %330 = vector.extract_strided_slice %327 {offsets = [0, 64], sizes = [2, 64], strides = [1, 1]} : vector<2x256xf32> to vector<2x64xf32>
    %331 = vector.extract_strided_slice %328 {offsets = [0, 128], sizes = [2, 64], strides = [1, 1]} : vector<2x256xf32> to vector<2x64xf32>
    %332 = vector.extract_strided_slice %327 {offsets = [0, 192], sizes = [2, 64], strides = [1, 1]} : vector<2x256xf32> to vector<2x64xf32>
    %333 = arith.mulf %330, %316 : vector<2x64xf32>
    %334 = arith.mulf %329, %331 : vector<2x64xf32>
    %335 = arith.addf %333, %334 : vector<2x64xf32>
    %336 = math.tanh %335 : vector<2x64xf32>
    %337 = arith.mulf %332, %336 : vector<2x64xf32>
    %c2_i32_90 = arith.constant 2 : i32
    %338 = arith.muli %c6_i32, %c2_i32_90 : i32
    %339 = arith.index_cast %338 : i32 to index
    %c0_91 = arith.constant 0 : index
    %340 = vector.load %arg3[%339, %c0_91] : memref<16x64xf32, #tpu.memory_space<vmem>>, vector<2x64xf32>
    %341 = arith.subf %337, %313 : vector<2x64xf32>
    %342 = arith.mulf %340, %341 : vector<2x64xf32>
    %343 = arith.addf %313, %342 : vector<2x64xf32>
    %344 = arith.subf %335, %316 : vector<2x64xf32>
    %345 = arith.mulf %340, %344 : vector<2x64xf32>
    %346 = arith.addf %316, %345 : vector<2x64xf32>
    %c7_i32 = arith.constant 7 : i32
    %c2_i32_92 = arith.constant 2 : i32
    %347 = arith.muli %c7_i32, %c2_i32_92 : i32
    %348 = arith.index_cast %347 : i32 to index
    %c0_93 = arith.constant 0 : index
    %349 = vector.load %arg16[%348, %c0_93] : memref<16x256xf32, #tpu.memory_space<vmem>>, vector<2x256xf32>
    %350 = arith.truncf %343 : vector<2x64xf32> to vector<2x64xbf16>
    %cst_94 = arith.constant dense<0.000000e+00> : vector<2x256xf32>
    %351 = tpu.matmul %350, %136, %cst_94 {dimension_numbers = #tpu.dot_dimension_numbers<[1], [0], [0], [1], [0, 0, 1, 1], [], []>} : vector<2x64xbf16>, vector<64x256xbf16>, vector<2x256xf32> -> vector<2x256xf32>
    %352 = arith.addf %349, %351 : vector<2x256xf32>
    %353 = arith.negf %352 : vector<2x256xf32>
    %354 = math.exp %353 : vector<2x256xf32>
    %cst_95 = arith.constant 1.000000e+00 : f32
    %355 = vector.broadcast %cst_95 : f32 to vector<2x256xf32>
    %356 = arith.addf %355, %354 : vector<2x256xf32>
    %357 = arith.divf %355, %356 : vector<2x256xf32>
    %358 = math.tanh %352 : vector<2x256xf32>
    %359 = vector.extract_strided_slice %357 {offsets = [0, 0], sizes = [2, 64], strides = [1, 1]} : vector<2x256xf32> to vector<2x64xf32>
    %360 = vector.extract_strided_slice %357 {offsets = [0, 64], sizes = [2, 64], strides = [1, 1]} : vector<2x256xf32> to vector<2x64xf32>
    %361 = vector.extract_strided_slice %358 {offsets = [0, 128], sizes = [2, 64], strides = [1, 1]} : vector<2x256xf32> to vector<2x64xf32>
    %362 = vector.extract_strided_slice %357 {offsets = [0, 192], sizes = [2, 64], strides = [1, 1]} : vector<2x256xf32> to vector<2x64xf32>
    %363 = arith.mulf %360, %346 : vector<2x64xf32>
    %364 = arith.mulf %359, %361 : vector<2x64xf32>
    %365 = arith.addf %363, %364 : vector<2x64xf32>
    %366 = math.tanh %365 : vector<2x64xf32>
    %367 = arith.mulf %362, %366 : vector<2x64xf32>
    %c2_i32_96 = arith.constant 2 : i32
    %368 = arith.muli %c7_i32, %c2_i32_96 : i32
    %369 = arith.index_cast %368 : i32 to index
    %c0_97 = arith.constant 0 : index
    %370 = vector.load %arg3[%369, %c0_97] : memref<16x64xf32, #tpu.memory_space<vmem>>, vector<2x64xf32>
    %371 = arith.subf %367, %343 : vector<2x64xf32>
    %372 = arith.mulf %370, %371 : vector<2x64xf32>
    %373 = arith.addf %343, %372 : vector<2x64xf32>
    %374 = arith.subf %365, %346 : vector<2x64xf32>
    %375 = arith.mulf %370, %374 : vector<2x64xf32>
    %376 = arith.addf %346, %375 : vector<2x64xf32>
    %c8_i32 = arith.constant 8 : i32
    %c0_98 = arith.constant 0 : index
    %c0_99 = arith.constant 0 : index
    %377 = vector.load %arg10[%c0_98, %c0_99] : memref<64x128xf32, #tpu.memory_space<vmem>>, vector<64x128xf32>
    %cst_100 = arith.constant dense<0.000000e+00> : vector<2x128xf32>
    %378 = tpu.matmul %373, %377, %cst_100 {dimension_numbers = #tpu.dot_dimension_numbers<[1], [0], [0], [1], [0, 0, 1, 1], [], []>} : vector<2x64xf32>, vector<64x128xf32>, vector<2x128xf32> -> vector<2x128xf32>
    %c0_101 = arith.constant 0 : index
    %c0_102 = arith.constant 0 : index
    %379 = vector.load %arg11[%c0_101, %c0_102] : memref<1x128xf32, #tpu.memory_space<vmem>>, vector<1x128xf32>
    %380 = vector.broadcast %379 : vector<1x128xf32> to vector<2x128xf32>
    %381 = arith.addf %378, %380 : vector<2x128xf32>
    %cst_103 = arith.constant dense<0xFF800000> : vector<2xf32>
    %382 = vector.multi_reduction <maximumf>, %381, %cst_103 [1] : vector<2x128xf32> to vector<2xf32>
    %383 = vector.shape_cast %382 : vector<2xf32> to vector<2x1xf32>
    %384 = vector.broadcast %383 : vector<2x1xf32> to vector<2x128xf32>
    %385 = arith.subf %381, %384 : vector<2x128xf32>
    %386 = math.exp %385 : vector<2x128xf32>
    %cst_104 = arith.constant dense<0.000000e+00> : vector<2xf32>
    %387 = vector.multi_reduction <add>, %386, %cst_104 [1] : vector<2x128xf32> to vector<2xf32>
    %388 = vector.shape_cast %387 : vector<2xf32> to vector<2x1xf32>
    %389 = tpu.reciprocal %388 {approx = true} : vector<2x1xf32> -> vector<2x1xf32>
    %390 = vector.broadcast %389 : vector<2x1xf32> to vector<2x128xf32>
    %391 = arith.mulf %386, %390 : vector<2x128xf32>
    %392 = vector.extract_strided_slice %391 {offsets = [0, 0], sizes = [2, 3], strides = [1, 1]} : vector<2x128xf32> to vector<2x3xf32>
    %393 = vector.extract_strided_slice %391 {offsets = [0, 3], sizes = [2, 3], strides = [1, 1]} : vector<2x128xf32> to vector<2x3xf32>
    %c0_105 = arith.constant 0 : index
    %c0_106 = arith.constant 0 : index
    %394 = vector.load %arg12[%c0_105, %c0_106] : memref<2x3xf32, #tpu.memory_space<vmem>>, vector<2x3xf32>
    %395 = arith.mulf %394, %392 : vector<2x3xf32>
    %c0_107 = arith.constant 0 : index
    %c0_108 = arith.constant 0 : index
    %396 = vector.load %arg13[%c0_107, %c0_108] : memref<2x3xf32, #tpu.memory_space<vmem>>, vector<2x3xf32>
    %397 = arith.mulf %396, %393 : vector<2x3xf32>
    %398 = arith.addf %395, %397 : vector<2x3xf32>
    %c0_109 = arith.constant 0 : index
    %c0_110 = arith.constant 0 : index
    %399 = vector.load %arg14[%c0_109, %c0_110] : memref<2x3xf32, #tpu.memory_space<vmem>>, vector<2x3xf32>
    tpu.vector_store %arg14[%c0_109, %c0_110], %398 {strides = array<i32>} : memref<2x3xf32, #tpu.memory_space<vmem>>, vector<2x3xf32>,
    return
  }
}

</mosaic_0001>

<bundles_post_ra>
// kernel: tpu_custom_call.1
= control target key start
LH: loop header
LB: loop body
LE: loop exit
PB: predicated region body
PF: predicated region fallthrough
CT: control target
= control target key end

     0   :  { %19 = vsyncpa [#allocation5], 0  ;;  %s2981_s0 = inlined_call_operand.hbm [shape: bf16[8,64], index: 0, kind: input, shape index: {}]   ;;  %s2982_s1 = inlined_call_operand.hbm [shape: bf16[16,64], index: 1, kind: input, shape index: {}]   ;;  %s2983_s2 = inlined_call_operand.hbm [shape: f32[8,64], index: 2, kind: input, shape index: {}]   ;;  %s2984_s3 = inlined_call_operand.hbm [shape: f32[16,64], index: 3, kind: input, shape index: {}]   ;;  %s2985_s4 = inlined_call_operand.hbm [shape: bf16[64,256], index: 4, kind: input, shape index: {}]   ;;  %s2986_s5 = inlined_call_operand.hbm [shape: bf16[64,256], index: 5, kind: input, shape index: {}]   ;;  %s2987_s6 = inlined_call_operand.vmem [shape: f32[1,256], index: 6, kind: input, shape index: {}]   ;;  %s2988_s7 = inlined_call_operand.hbm [shape: bf16[64,256], index: 7, kind: input, shape index: {}]   ;;  %s2989_s8 = inlined_call_operand.hbm [shape: bf16[64,256], index: 8, kind: input, shape index: {}]   ;;  %s2990_s9 = inlined_call_operand.vmem [shape: f32[1,256], index: 9, kind: input, shape index: {}]   ;;  %s2991_s10 = inlined_call_operand.hbm [shape: f32[64,128], index: 10, kind: input, shape index: {}]   ;;  %s2992_s11 = inlined_call_operand.vmem [shape: f32[1,128], index: 11, kind: input, shape index: {}]   ;;  %s2993_s12 = inlined_call_operand.vmem [shape: f32[2,3], index: 12, kind: input, shape index: {}]   ;;  %s2994_s13 = inlined_call_operand.vmem [shape: f32[2,3], index: 13, kind: input, shape index: {}]   ;;  %s2995_s14 = inlined_call_operand.hbm [shape: f32[2,3], index: 14, kind: output, shape index: {}]  }
   0x1   :  { %20 = vsyncpa [#allocation8], 0 }
   0x2   :  { %21 = vsyncpa [#allocation11], 0 }
   0x3   :  { %22 = vsyncpa [#allocation14], 0 }
   0x4   :  { %23 = vsyncpa [#allocation17], 0  ;;  %s40_s15 = sshll.u32 %s2982_s1, 4  ;;  %s41_s15 = int_to_ptr.hbm [resolvable:$true] %s40_s15 }
   0x5   :  { %24 = vsyncpa [#allocation6], 0  ;;  %s2507_s16 = smov [#allocation7]   ;;  %s64_s20 = sshll.u32 %s2984_s3, 4  ;;  %s65_s20 = int_to_ptr.hbm [resolvable:$true] %s64_s20 }
   0x6   :  { %s42_s17 = sshll.u32 %s2507_s16, 4  ;;  %s2508_s21 = smov 64   ;;  %s43_s17 = int_to_ptr.vmem [resolvable:$true] %s42_s17 }
   0x7   :  { %s2509_s22 = smov 4   ;;  %s2510_s23 = smov [#allocation10]  }
   0x8   :  { %48 = dma.hbm_to_vmem [thread:$0]  %s41_s15, 128, %s43_s17, [#allocation8], %s2508_s21, %s2508_s21, %s2509_s22  }
   0x9   :  { %s66_s24 = sshll.u32 %s2510_s23, 4  ;;  %s2511_s25 = smov 128   ;;  %s67_s24 = int_to_ptr.vmem [resolvable:$true] %s66_s24 }
   0xa   :  { %s2512_s1 = smov 8   ;;  %s90_s28 = sshll.u32 %s2986_s5, 4  ;;  %s91_s28 = int_to_ptr.hbm [resolvable:$true] %s90_s28 }
   0xb   :  { %72 = dma.hbm_to_vmem [thread:$0]  %s65_s20, 256, %s67_s24, [#allocation11], %s2511_s25, %s2511_s25, %s2512_s1  }
   0xc   :  { %s2513_s3 = smov [#allocation13]   ;;  %s118_s16 = sshll.u32 %s2989_s8, 4  ;;  %s119_s16 = int_to_ptr.hbm [resolvable:$true] %s118_s16 }
   0xd   :  { %s92_s29 = sshll.u32 %s2513_s3, 4  ;;  %s2514_s17 = smov [#allocation16]   ;;  %s93_s29 = int_to_ptr.vmem [resolvable:$true] %s92_s29 }
   0xe   :  { %98 = dma.hbm_to_vmem [thread:$0]  %s91_s28, 1024, %s93_s29, [#allocation14], %s2511_s25, %s2511_s25, %s2512_s1  }
   0xf   :  { %s120_s18 = sshll.u32 %s2514_s17, 4  ;;  %s30_s22 = sshll.u32 %s2981_s0, 4  ;;  %s121_s18 = int_to_ptr.vmem [resolvable:$true] %s120_s18  ;;  %s31_s22 = int_to_ptr.hbm [resolvable:$true] %s30_s22 }
  0x10   :  { %126 = dma.hbm_to_vmem [thread:$0]  %s119_s16, 1024, %s121_s18, [#allocation17], %s2511_s25, %s2511_s25, %s2512_s1  }
  0x11   :  { %s54_s8 = sshll.u32 %s2983_s2, 4  ;;  %s2515_s24 = smov [#allocation4]   ;;  %s55_s8 = int_to_ptr.hbm [resolvable:$true] %s54_s8 }
  0x12   :  { %s32_s26 = sshll.u32 %s2515_s24, 4  ;;  %s2516_s27 = smov [#allocation9]   ;;  %s33_s26 = int_to_ptr.vmem [resolvable:$true] %s32_s26 }
  0x13   :  { %35 = dma.hbm_to_vmem [thread:$0]  %s31_s22, 64, %s33_s26, [#allocation5]  }
  0x14   :  { %s56_s28 = sshll.u32 %s2516_s27, 4  ;;  %s77_s0 = sshll.u32 %s2985_s4, 4  ;;  %s57_s28 = int_to_ptr.vmem [resolvable:$true] %s56_s28  ;;  %s78_s0 = int_to_ptr.hbm [resolvable:$true] %s77_s0 }
  0x15   :  { %59 = dma.hbm_to_vmem [thread:$0]  %s55_s8, 128, %s57_s28, [#allocation8]  }
  0x16   :  { %s105_s16 = sshll.u32 %s2988_s7, 4  ;;  %s2517_s17 = smov [#allocation12]   ;;  %s106_s16 = int_to_ptr.hbm [resolvable:$true] %s105_s16 }
  0x17   :  { %s79_s2 = sshll.u32 %s2517_s17, 4  ;;  %s2518_s18 = smov [#allocation15]   ;;  %s80_s2 = int_to_ptr.vmem [resolvable:$true] %s79_s2 }
  0x18   :  { %85 = dma.hbm_to_vmem [thread:$0]  %s78_s0, 1024, %s80_s2, [#allocation11], %s2511_s25, %s2511_s25, %s2512_s1  }
  0x19   :  { %s107_s19 = sshll.u32 %s2518_s18, 4  ;;  %s133_s4 = sshll.u32 %s2991_s10, 4  ;;  %s108_s19 = int_to_ptr.vmem [resolvable:$true] %s107_s19  ;;  %s134_s4 = int_to_ptr.hbm [resolvable:$true] %s133_s4 }
  0x1a   :  { %113 = dma.hbm_to_vmem [thread:$0]  %s106_s16, 1024, %s108_s19, [#allocation14], %s2511_s25, %s2511_s25, %s2512_s1  }
  0x1b   :  { %s2519_s7 = smov [#allocation18]  }
  0x1c   :  { %s135_s5 = sshll.u32 %s2519_s7, 4  ;;  %s136_s5 = int_to_ptr.vmem [resolvable:$true] %s135_s5 }
  0x1d   :  { %141 = dma.hbm_to_vmem [thread:$0]  %s134_s4, 1024, %s136_s5, [#allocation17], %s2511_s25, %s2511_s25, %s2512_s1  }
  0x1e   :  { %2495 = dma.done.wait [#allocation5], 64  }
  0x1f   :  { %2496 = vsyncadd [#allocation5], 4294967232 }
  0x20   :  { %2497 = dma.done.wait [#allocation8], 256  }
  0x21   :  { %2498 = vsyncadd [#allocation8], 4294967040 }
  0x22   :  { %2499 = dma.done.wait [#allocation11], 1280  }
  0x23   :  { %2500 = vsyncadd [#allocation11], 4294966016 }
  0x24   :  { %2501 = dma.done.wait [#allocation14], 2048  }
  0x25   :  { %2502 = vsyncadd [#allocation14], 4294965248 }
  0x26   :  { %2503 = dma.done.wait [#allocation17], 2048  }
  0x27   :  { %2504 = vsyncadd [#allocation17], 4294965248  ;;  %v1900_v0 = vld [vmem:[#allocation12 + $0x30] sm:$0xf]  ;;  %v2064_v1 = vld [vmem:[#allocation12 + $0x34] sm:$0xf0] }
  0x28   :  { %v2063_v2 = vld [vmem:[#allocation12 + $0x34] sm:$0xf]  ;;  %v1901_v3 = vor.u32 %v2064_v1, %v1900_v0  ;;  %v1902_v4 = vld [vmem:[#allocation12 + $0x38] sm:$0xf0]  ;;  %v1892_v5 = vld [vmem:[#allocation12 + $0x20] sm:$0xf] }
  0x29   :  { %v2062_v6 = vld [vmem:[#allocation12 + $0x24] sm:$0xf0]  ;;  %v1905_v7 = vor.u32 %v2063_v2, %v1902_v4  ;;  %v2061_v8 = vld [vmem:[#allocation12 + $0x24] sm:$0xf]  ;;  %v1894_v9 = vld [vmem:[#allocation12 + $0x28] sm:$0xf0] }
  0x2a   :  { %248 = vmatpush.bf16.msra.mxu0 %v1901_v3  ;;  %v1893_v10 = vor.u32 %v2062_v6, %v1892_v5  ;;  %v1897_v11 = vor.u32 %v2061_v8, %v1894_v9  ;;  %v1884_v12 = vld [vmem:[#allocation12 + $0x10] sm:$0xf]  ;;  %v2060_v13 = vld [vmem:[#allocation12 + $0x14] sm:$0xf0]  ;;  %v2059_v14 = vld [vmem:[#allocation12 + $0x14] sm:$0xf] }
  0x2b   :  { %261 = vmatpush.bf16.msra.mxu1 %v1905_v7  ;;  %v1886_v15 = vld [vmem:[#allocation12 + $0x18] sm:$0xf0]  ;;  %v1885_v16 = vor.u32 %v2060_v13, %v1884_v12  ;;  %v1876_v18 = vld [vmem:[#allocation12] sm:$0xf]  ;;  %v2058_v19 = vld [vmem:[#allocation12 + $0x4] sm:$0xf0] }
  0x2c   :  { %v1889_v17 = vor.u32 %v2059_v14, %v1886_v15  ;;  %v2057_v20 = vld [vmem:[#allocation12 + $0x4] sm:$0xf]  ;;  %v1878_v21 = vld [vmem:[#allocation12 + $0x8] sm:$0xf0]  ;;  %v1972_v22 = vld [vmem:[#allocation13 + $0x30] sm:$0xf]  ;;  %v1877_v26 = vor.u32 %v2058_v19, %v1876_v18 }
  0x2d   :  { %v2081_v23 = vld [vmem:[#allocation13 + $0x34] sm:$0xf0]  ;;  %v2080_v24 = vld [vmem:[#allocation13 + $0x34] sm:$0xf]  ;;  %v1974_v25 = vld [vmem:[#allocation13 + $0x38] sm:$0xf0]  ;;  %v1881_v27 = vor.u32 %v2057_v20, %v1878_v21 }
  0x2e   :  { %249 = vmatpush.bf16.msra.mxu0 %v1893_v10  ;;  %v2645_v28 = vor.u32 %v2081_v23, %v1972_v22  ;;  %v2647_v29 = vor.u32 %v2080_v24, %v1974_v25  ;;  %v1964_v30 = vld [vmem:[#allocation13 + $0x20] sm:$0xf]  ;;  %v2079_v31 = vld [vmem:[#allocation13 + $0x24] sm:$0xf0]  ;;  %v2078_v32 = vld [vmem:[#allocation13 + $0x24] sm:$0xf] }
  0x2f   :  { %262 = vmatpush.bf16.msra.mxu1 %v1897_v11  ;;  %v1966_v33 = vld [vmem:[#allocation13 + $0x28] sm:$0xf0]  ;;  %v185_v34 = vld [vmem:[#allocation4] sm:$0xf]  ;;  %vm240_vm0 = vcmask 523264   ;;  %v2650_v35 = vor.u32 %v2079_v31, %v1964_v30  ;;  %v2520_v49 = vmov 0  }
  0x30   :  { %v2653_v36 = vor.u32 %v2078_v32, %v1966_v33  ;;  %v1956_v37 = vld [vmem:[#allocation13 + $0x10] sm:$0xf]  ;;  %v2077_v38 = vld [vmem:[#allocation13 + $0x14] sm:$0xf0]  ;;  %v2076_v39 = vld [vmem:[#allocation13 + $0x14] sm:$0xf] }
  0x31   :  { %v1958_v40 = vld [vmem:[#allocation13 + $0x18] sm:$0xf0]  ;;  %v2658_v41 = vor.u32 %v2077_v38, %v1956_v37  ;;  %v1948_v43 = vld [vmem:[#allocation13] sm:$0xf]  ;;  %v2075_v44 = vld [vmem:[#allocation13 + $0x4] sm:$0xf0] }
  0x32   :  { %250 = vmatpush.bf16.msra.mxu0 %v1885_v16  ;;  %v2661_v42 = vor.u32 %v2076_v39, %v1958_v40  ;;  %v2074_v45 = vld [vmem:[#allocation13 + $0x4] sm:$0xf]  ;;  %v1950_v46 = vld [vmem:[#allocation13 + $0x8] sm:$0xf0]  ;;  %v2664_v47 = vor.u32 %v2075_v44, %v1948_v43  ;;  %v1938_v21 = vld [vmem:[#allocation15 + $0x30] sm:$0xf] }
  0x33   :  { %263 = vmatpush.bf16.msra.mxu1 %v1889_v17  ;;  %v2667_v48 = vor.u32 %v2074_v45, %v1950_v46  ;;  %v194_v50 = vld [vmem:[%s2987_s6] sm:$0x3]  ;;  %v2073_v22 = vld [vmem:[#allocation15 + $0x34] sm:$0xf0]  ;;  %v1930_v23 = vld [vmem:[#allocation15 + $0x20] sm:$0xf] }
  0x34   :  { %v196_v51 = vperm.slane %v194_v50, 0  ;;  %v197_v52 = vperm.slane %v194_v50, 1  ;;  %v1939_v24 = vor.u32 %v2073_v22, %v1938_v21  ;;  %v2071_v25 = vld [vmem:[#allocation15 + $0x24] sm:$0xf0]  ;;  %v2070_v32 = vld [vmem:[#allocation15 + $0x24] sm:$0xf] }
  0x35   :  { %v1931_v30 = vor.u32 %v2071_v25, %v1930_v23  ;;  %v1932_v33 = vld [vmem:[#allocation15 + $0x28] sm:$0xf0]  ;;  %v2069_v37 = vld [vmem:[#allocation15 + $0x14] sm:$0xf0]  ;;  %v2068_v39 = vld [vmem:[#allocation15 + $0x14] sm:$0xf] }
  0x36   :  { %251 = vmatpush.bf16.msra.mxu0 %v1877_v26  ;;  %v2072_v26 = vld [vmem:[#allocation15 + $0x34] sm:$0xf]  ;;  %340 = vmatpush.bf16.msra.mxu2 %v1939_v24  ;;  %v1935_v38 = vor.u32 %v2070_v32, %v1932_v33  ;;  %v1924_v40 = vld [vmem:[#allocation15 + $0x18] sm:$0xf0]  ;;  %v1914_v45 = vld [vmem:[#allocation15] sm:$0xf] }
  0x37   :  { %264 = vmatpush.bf16.msra.mxu1 %v1881_v27  ;;  %v1940_v27 = vld [vmem:[#allocation15 + $0x38] sm:$0xf0]  ;;  %v2067_v46 = vld [vmem:[#allocation15 + $0x4] sm:$0xf0]  ;;  %s2522_s27 = smov [#allocation19]   ;;  %s1860_s0 = sshll.u32 %s2995_s14, 4  ;;  %s1861_s0 = int_to_ptr.hbm [resolvable:$true] %s1860_s0 }
  0x38   :  { %v1943_v31 = vor.u32 %v2072_v26, %v1940_v27  ;;  %s1858_s28 = sshll.u32 %s2522_s27, 4  ;;  %s1859_s28 = int_to_ptr.vmem [resolvable:$true] %s1858_s28 }
  0x39   :  { %1906 = vmatmul.msk.bf16.vlgmr.msra.gmra.mxu0 %vm240_vm0, %v185_v34 }
  0x3a   :  { %425 = vmatpush.bf16.msrb.mxu0 %v2645_v28  ;;  %1907 = vmatmul.msk.bf16.vlgmr.msra.gmra.mxu1 %vm240_vm0, %v185_v34  ;;  %v1922_v34 = vld [vmem:[#allocation15 + $0x10] sm:$0xf] }
  0x3b   :  { %438 = vmatpush.bf16.msrb.mxu1 %v2647_v29  ;;  %354 = vmatpush.bf16.msra.mxu3 %v1943_v31  ;;  %v1923_v44 = vor.u32 %v2069_v37, %v1922_v34 }
  0x3c   :  { %341 = vmatpush.bf16.msra.mxu2 %v1931_v30 }
  0x3e   :  { %426 = vmatpush.bf16.msrb.mxu0 %v2650_v35 }
  0x3f   :  { %439 = vmatpush.bf16.msrb.mxu1 %v2653_v36  ;;  %355 = vmatpush.bf16.msra.mxu3 %v1935_v38 }
  0x40   :  { %342 = vmatpush.bf16.msra.mxu2 %v1923_v44 }
  0x42   :  { %427 = vmatpush.bf16.msrb.mxu0 %v2658_v41 }
  0x43   :  { %440 = vmatpush.bf16.msrb.mxu1 %v2661_v42 }
  0x46   :  { %428 = vmatpush.bf16.msrb.mxu0 %v2664_v47 }
  0x47   :  { %441 = vmatpush.bf16.msrb.mxu1 %v2667_v48 }
  0x49   :  { %429 = vmatmul.bf16.vlgmr.msrb.gmra.mxu0 %v2520_v49 }
  0x4a   :  { %635 = vmatpush.bf16.msra.mxu0 %v2645_v28  ;;  %442 = vmatmul.bf16.vlgmr.msrb.gmra.mxu1 %v2520_v49  ;;  %v1927_v49 = vor.u32 %v2068_v39, %v1924_v40 }
  0x4b   :  { %648 = vmatpush.bf16.msra.mxu1 %v2647_v29 }
  0x4c   :  { %356 = vmatpush.bf16.msra.mxu3 %v1927_v49 }
  0x4e   :  { %636 = vmatpush.bf16.msra.mxu0 %v2650_v35 }
  0x4f   :  { %649 = vmatpush.bf16.msra.mxu1 %v2653_v36 }
  0x52   :  { %637 = vmatpush.bf16.msra.mxu0 %v2658_v41 }
  0x53   :  { %650 = vmatpush.bf16.msra.mxu1 %v2661_v42 }
  0x56   :  { %638 = vmatpush.bf16.msra.mxu0 %v2664_v47 }
  0x57   :  { %651 = vmatpush.bf16.msra.mxu1 %v2667_v48 }
  0xb6   :  { %v253_v53 = vpop.f32.mrf.mxu0 }
  0xb7   :  { %v254_v54 = vadd.f32 %v253_v53, %v196_v51  ;;  %v266_v55 = vpop.f32.mrf.mxu1  ;;  %v2066_v51 = vld [vmem:[#allocation15 + $0x4] sm:$0xf]  ;;  %v1915_v53 = vor.u32 %v2067_v46, %v1914_v45 }
  0xb8   :  { %v267_v56 = vadd.f32 %v266_v55, %v197_v52  ;;  %v1916_v52 = vld [vmem:[#allocation15 + $0x8] sm:$0xf0] }
  0xb9   :  { %270 = vst [vmem:[#allocation2] sm:$0xff] %v254_v54  ;;  %v1919_v54 = vor.u32 %v2066_v51, %v1916_v52  ;;  %343 = vmatpush.bf16.msra.mxu2 %v1915_v53 }
  0xba   :  { %271 = vst [vmem:[#allocation2 + $0x8] sm:$0xff] %v267_v56  ;;  %v2065_v56 = vld [vmem:[#allocation7] sm:$0xff] }
  0xbb   :  { %357 = vmatpush.bf16.msra.mxu3 %v1919_v54 }
  0xbc   :  { %1944 = vmatmul.msk.bf16.vlgmr.msra.gmra.mxu2 %vm240_vm0, %v2065_v56 }
  0xbd   :  { %520 = vmatpush.bf16.msrb.mxu2 %v2645_v28 }
  0xbe   :  { %v255_v57 = vpop.f32.mrf.mxu0  ;;  %1945 = vmatmul.msk.bf16.vlgmr.msra.gmra.mxu3 %vm240_vm0, %v2065_v56 }
  0xbf   :  { %v268_v58 = vpop.f32.mrf.mxu1  ;;  %533 = vmatpush.bf16.msrb.mxu3 %v2647_v29 }
  0xc0   :  { %v376_v59 = vld [vmem:[#allocation2] sm:$0x3] }
  0xc1   :  { %v377_v4 = vld [vmem:[#allocation2 + $0x8] sm:$0x3]  ;;  %521 = vmatpush.bf16.msrb.mxu2 %v2650_v35  ;;  %v511_v26 = vld [vmem:[#allocation2 + $0x8] sm:$0xc] }
  0xc3   :  { %534 = vmatpush.bf16.msrb.mxu3 %v2653_v36 }
  0xc5   :  { %522 = vmatpush.bf16.msrb.mxu2 %v2658_v41 }
  0xc6   :  { %v430_v60 = vpop.f32.mrf.mxu0 }
  0xc7   :  { %v447_v61 = vadd.f32 %v430_v60, %v376_v59  ;;  %v443_v62 = vpop.f32.mrf.mxu1  ;;  %535 = vmatpush.bf16.msrb.mxu3 %v2661_v42 }
  0xc8   :  { %v448_v7 = vadd.f32 %v443_v62, %v377_v4 }
  0xc9   :  { %v1978_v63 = vmul.f32 -1.442695, %v447_v61  ;;  %523 = vmatpush.bf16.msrb.mxu2 %v2664_v47 }
  0xca   :  { %v1979_v18 = vmul.f32 -1.442695, %v448_v7 }
  0xcb   :  { %2107 = vpow2.f32 %v1978_v63  ;;  %536 = vmatpush.bf16.msrb.mxu3 %v2667_v48 }
  0xcd   :  { %750 = vmatpush.bf16.msra.mxu2 %v2645_v28  ;;  %v497_v28 = vld [vmem:[#allocation9] sm:$0x3] }
  0xce   :  { %v432_v0 = vpop.f32.mrf.mxu0 }
  0xcf   :  { %v445_v1 = vpop.f32.mrf.mxu1  ;;  %763 = vmatpush.bf16.msra.mxu3 %v2647_v29 }
  0xd1   :  { %v2108_v2 = vpop.eup %2107  ;;  %751 = vmatpush.bf16.msra.mxu2 %v2650_v35 }
  0xd2   :  { %v455_v3 = vadd.f32 1.0, %v2108_v2 }
  0xd3   :  { %764 = vmatpush.bf16.msra.mxu3 %v2653_v36 }
  0xd4   :  { %2109 = vrcp.f32 %v455_v3  ;;  %v468_v9 = vand.u32 2147483648, %v455_v3  ;;  %v466_v11 = vand.u32 2147483647, %v455_v3  ;;  %vm462_vm2 = vweird.f32 %v455_v3 }
  0xd5   :  { %2111 = vtanh.f32 %v448_v7  ;;  %752 = vmatpush.bf16.msra.mxu2 %v2658_v41  ;;  %v282_v41 = vld [vmem:[%s2990_s9] sm:$0x3] }
  0xd6   :  { %v469_v13 = vor.u32 1.1754944e-38, %v468_v9  ;;  %vm467_vm4 = vcmp.eq.f32.partialorder %v466_v11, 8.507059e+37  ;;  %2113 = vpow2.f32 %v1979_v18  ;;  %v510_v18 = vld [vmem:[#allocation2] sm:$0xc] }
  0xd7   :  { %765 = vmatpush.bf16.msra.mxu3 %v2661_v42 }
  0xd9   :  { %753 = vmatpush.bf16.msra.mxu2 %v2664_v47 }
  0xda   :  { %v2110_v5 = vpop.eup %2109 }
  0xdb   :  { %v458_v6 = vmul.f32 %v2110_v5, %v455_v3  ;;  %vm463_vm1 = vweird.f32 %v2110_v5  ;;  %v2112_v15 = vpop.eup %2111  ;;  %766 = vmatpush.bf16.msra.mxu3 %v2667_v48  ;;  %v284_v48 = vperm.slane %v282_v41, 0 }
  0xdc   :  { %vm464_vm3 = vmor %vm462_vm2, %vm463_vm1  ;;  %v2114_v19 = vpop.eup %2113 }
  0xdd   :  { %v459_v8 = vsub.f32 1.0, %v458_v6  ;;  %v456_v20 = vadd.f32 1.0, %v2114_v19 }
  0xdf   :  { %v460_v10 = vmul.f32 %v2110_v5, %v459_v8  ;;  %2115 = vrcp.f32 %v456_v20  ;;  %vm477_vm5 = vweird.f32 %v456_v20  ;;  %v483_v61 = vand.u32 2147483648, %v456_v20 }
  0xe0   :  { %v481_v63 = vand.u32 2147483647, %v456_v20  ;;  %v285_v8 = vperm.slane %v282_v41, 1 }
  0xe1   :  { %v461_v12 = vadd.f32 %v2110_v5, %v460_v10  ;;  %v484_v0 = vor.u32 1.1754944e-38, %v483_v61 }
  0xe2   :  { %vm482_vm8 = vcmp.eq.f32.partialorder %v481_v63, 8.507059e+37 }
  0xe3   :  { %v465_v14 = vsel %vm464_vm3, %v2110_v5, %v461_v12 }
  0xe4   :  { %v470_v16 = vsel %vm467_vm4, %v469_v13, %v465_v14 }
  0xe5   :  { %v489_v17 = vmul.f32 %v2112_v15, %v470_v16  ;;  %v2116_v43 = vpop.eup %2115  ;;  %v488_v58 = vmul.f32 0.0, %v470_v16 }
  0xe6   :  { %v473_v50 = vmul.f32 %v2116_v43, %v456_v20  ;;  %vm478_vm6 = vweird.f32 %v2116_v43 }
  0xe7   :  { %491 = vrot.lane.b32.xlu0 %v489_v17, %s2508_s21  ;;  %vm479_vm7 = vmor %vm477_vm5, %vm478_vm6 }
  0xe8   :  { %v474_v55 = vsub.f32 1.0, %v473_v50 }
  0xea   :  { %v475_v57 = vmul.f32 %v2116_v43, %v474_v55 }
  0xec   :  { %v476_v62 = vadd.f32 %v2116_v43, %v475_v57 }
  0xee   :  { %v480_v1 = vsel %vm479_vm7, %v2116_v43, %v476_v62 }
  0xef   :  { %v485_v3 = vsel %vm482_vm8, %v484_v0, %v480_v1 }
 0x13f   :  { %v345_v42 = vpop.f32.mrf.mxu2 }
 0x140   :  { %v346_v9 = vadd.f32 %v345_v42, %v284_v48 }
 0x141   :  { %v359_v47 = vpop.f32.mrf.mxu3 }
 0x142   :  { %v360_v10 = vadd.f32 %v359_v47, %v285_v8  ;;  %364 = vst [vmem:[#allocation3 + $0x8] sm:$0xff] %v346_v9 }
 0x144   :  { %365 = vst [vmem:[#allocation3 + $0x10] sm:$0xff] %v360_v10 }
 0x147   :  { %v347_v11 = vpop.f32.mrf.mxu2 }
 0x148   :  { %v348_v13 = vadd.f32 %v347_v11, %v284_v48 }
 0x149   :  { %v361_v12 = vpop.f32.mrf.mxu3 }
 0x14a   :  { %v362_v14 = vadd.f32 %v361_v12, %v285_v8  ;;  %366 = vst [vmem:[#allocation3] sm:$0xff] %v348_v13 }
 0x14c   :  { %367 = vst [vmem:[#allocation3 + $0x18] sm:$0xff] %v362_v14 }
 0x159   :  { %v492_v59 = vpop.permute.xlu0 %491 }
 0x15a   :  { %v494_v60 = vadd.f32 %v492_v59, %v488_v58 }
 0x15c   :  { %2117 = vtanh.f32 %v494_v60  ;;  %505 = vrot.lane.b32.xlu1 %v494_v60, %s2508_s21 }
 0x162   :  { %v2118_v2 = vpop.eup %2117 }
 0x163   :  { %v496_v4 = vmul.f32 %v2118_v2, %v485_v3 }
 0x165   :  { %499 = vrot.lane.b32.xlu0 %v496_v4, %s2508_s21 }
 0x1ce   :  { %v506_v5 = vpop.permute.xlu1 %505 }
 0x1cf   :  { %v2703_v6 = vmul.f32 %v506_v5, %v497_v28 }
 0x1d1   :  { %v590_v29 = vrot.slane %v2703_v6, 6 }
 0x1d3   :  { %591 = vrot.lane.b32.xlu1 %v590_v29, %s2508_s21 }
 0x1d7   :  { %v500_v7 = vpop.permute.xlu0 %499 }
 0x1d8   :  { %v2707_v35 = vmul.f32 %v500_v7, %v497_v28 }
 0x1da   :  { %v512_v36 = vpack.c.bf16 %v2707_v35, %v2707_v35  ;;  %v605_v46 = vrot.slane %v2707_v35, 6 }
 0x1dc   :  { %1980 = vmatmul.msk.bf16.vlgmr.msrb.gmra.mxu2 %vm240_vm0, %v512_v36  ;;  %1981 = vmatmul.msk.bf16.vlgmr.msrb.gmra.mxu3 %vm240_vm0, %v512_v36  ;;  %v603_v36 = vld [vmem:[#allocation9 + $0x2] sm:$0x3] }
 0x245   :  { %v592_v55 = vpop.permute.xlu1 %591 }
 0x25f   :  { %v525_v15 = vpop.f32.mrf.mxu2  ;;  %v538_v16 = vpop.f32.mrf.mxu3 }
 0x260   :  { %v544_v17 = vrot.slane %v525_v15, 6  ;;  %v545_v25 = vrot.slane %v538_v16, 6  ;;  %v625_v15 = vld [vmem:[#allocation2] sm:$0x30] }
 0x262   :  { %v548_v19 = vadd.f32 %v544_v17, %v510_v18  ;;  %v549_v30 = vadd.f32 %v545_v25, %v511_v26 }
 0x264   :  { %v1982_v20 = vmul.f32 -1.442695, %v548_v19  ;;  %v1983_v49 = vmul.f32 -1.442695, %v549_v30 }
 0x266   :  { %2119 = vpow2.f32 %v1982_v20 }
 0x267   :  { %v527_v21 = vpop.f32.mrf.mxu2  ;;  %v540_v22 = vpop.f32.mrf.mxu3 }
 0x268   :  { %v626_v22 = vld [vmem:[#allocation2 + $0x8] sm:$0x30] }
 0x26c   :  { %v2120_v23 = vpop.eup %2119 }
 0x26d   :  { %v556_v24 = vadd.f32 1.0, %v2120_v23 }
 0x26f   :  { %2121 = vrcp.f32 %v556_v24  ;;  %v569_v33 = vand.u32 2147483648, %v556_v24  ;;  %v567_v37 = vand.u32 2147483647, %v556_v24  ;;  %vm563_vm10 = vweird.f32 %v556_v24 }
 0x270   :  { %2123 = vtanh.f32 %v549_v30 }
 0x271   :  { %v570_v39 = vor.u32 1.1754944e-38, %v569_v33  ;;  %vm568_vm12 = vcmp.eq.f32.partialorder %v567_v37, 8.507059e+37  ;;  %2125 = vpow2.f32 %v1983_v49 }
 0x275   :  { %v2122_v27 = vpop.eup %2121 }
 0x276   :  { %v559_v31 = vmul.f32 %v2122_v27, %v556_v24  ;;  %vm564_vm9 = vweird.f32 %v2122_v27  ;;  %v2124_v43 = vpop.eup %2123 }
 0x277   :  { %vm565_vm11 = vmor %vm563_vm10, %vm564_vm9  ;;  %v2126_v50 = vpop.eup %2125 }
 0x278   :  { %v560_v32 = vsub.f32 1.0, %v559_v31  ;;  %v557_v51 = vadd.f32 1.0, %v2126_v50 }
 0x27a   :  { %v561_v34 = vmul.f32 %v2122_v27, %v560_v32  ;;  %2127 = vrcp.f32 %v557_v51  ;;  %v584_v62 = vand.u32 2147483648, %v557_v51  ;;  %vm578_vm14 = vweird.f32 %v557_v51 }
 0x27b   :  { %v582_v63 = vand.u32 2147483647, %v557_v51 }
 0x27c   :  { %v562_v38 = vadd.f32 %v2122_v27, %v561_v34  ;;  %v585_v2 = vor.u32 1.1754944e-38, %v584_v62 }
 0x27d   :  { %vm583_vm1 = vcmp.eq.f32.partialorder %v582_v63, 8.507059e+37 }
 0x27e   :  { %v566_v40 = vsel %vm565_vm11, %v2122_v27, %v562_v38 }
 0x27f   :  { %v571_v44 = vsel %vm568_vm12, %v570_v39, %v566_v40 }
 0x280   :  { %v595_v45 = vmul.f32 %v2124_v43, %v571_v44  ;;  %v2128_v52 = vpop.eup %2127  ;;  %v594_v57 = vmul.f32 %v592_v55, %v571_v44 }
 0x281   :  { %v574_v53 = vmul.f32 %v2128_v52, %v557_v51  ;;  %vm579_vm13 = vweird.f32 %v2128_v52 }
 0x282   :  { %597 = vrot.lane.b32.xlu2 %v595_v45, %s2508_s21  ;;  %vm580_vm15 = vmor %vm578_vm14, %vm579_vm13 }
 0x283   :  { %v575_v54 = vsub.f32 1.0, %v574_v53 }
 0x285   :  { %v576_v56 = vmul.f32 %v2128_v52, %v575_v54 }
 0x287   :  { %v577_v60 = vadd.f32 %v2128_v52, %v576_v56 }
 0x289   :  { %v581_v1 = vsel %vm580_vm15, %v2128_v52, %v577_v60 }
 0x28a   :  { %606 = vrot.lane.b32.xlu2 %v605_v46, %s2508_s21  ;;  %v586_v4 = vsel %vm583_vm1, %v585_v2, %v581_v1 }
 0x2dc   :  { %v598_v58 = vpop.permute.xlu2 %597 }
 0x2dd   :  { %v600_v59 = vadd.f32 %v598_v58, %v594_v57 }
 0x2df   :  { %2129 = vtanh.f32 %v600_v59  ;;  %v617_v61 = vsub.f32 %v600_v59, %v592_v55 }
 0x2e1   :  { %v619_v0 = vrot.slane %v617_v61, 2 }
 0x2e3   :  { %620 = vrot.lane.b32.xlu1 %v619_v0, %s2508_s21 }
 0x2e4   :  { %v607_v5 = vpop.permute.xlu2 %606 }
 0x2e5   :  { %v2130_v3 = vpop.eup %2129 }
 0x2e6   :  { %v602_v28 = vmul.f32 %v2130_v3, %v586_v4  ;;  %v718_v4 = vld [vmem:[#allocation9 + $0x4] sm:$0x3] }
 0x2e8   :  { %v609_v29 = vsub.f32 %v602_v28, %v607_v5 }
 0x2ea   :  { %v611_v7 = vrot.slane %v609_v29, 2 }
 0x2ec   :  { %612 = vrot.lane.b32.xlu0 %v611_v7, %s2508_s21 }
 0x355   :  { %v621_v41 = vpop.permute.xlu1 %620 }
 0x356   :  { %v623_v42 = vmul.f32 %v621_v41, %v603_v36 }
 0x358   :  { %v2722_v47 = vadd.f32 %v623_v42, %v2703_v6 }
 0x35a   :  { %v705_v48 = vrot.slane %v2722_v47, 4 }
 0x35c   :  { %706 = vrot.lane.b32.xlu2 %v705_v48, %s2508_s21 }
 0x35e   :  { %v613_v8 = vpop.permute.xlu0 %612 }
 0x35f   :  { %v615_v9 = vmul.f32 %v613_v8, %v603_v36 }
 0x361   :  { %v2727_v10 = vadd.f32 %v615_v9, %v2707_v35 }
 0x363   :  { %v627_v11 = vpack.c.bf16 %v2727_v10, %v2727_v10  ;;  %v720_v12 = vrot.slane %v2727_v10, 4 }
 0x365   :  { %721 = vrot.lane.b32.xlu1 %v720_v12, %s2508_s21  ;;  %1984 = vmatmul.msk.bf16.vlgmr.msra.gmra.mxu0 %vm240_vm0, %v627_v11  ;;  %v740_v12 = vld [vmem:[#allocation2] sm:$0xc0] }
 0x366   :  { %1985 = vmatmul.msk.bf16.vlgmr.msra.gmra.mxu1 %vm240_vm0, %v627_v11 }
 0x3b6   :  { %v707_v50 = vpop.permute.xlu2 %706 }
 0x3d7   :  { %v722_v1 = vpop.permute.xlu1 %721 }
 0x3e2   :  { %v640_v6 = vpop.f32.mrf.mxu0 }
 0x3e3   :  { %v659_v13 = vrot.slane %v640_v6, 4  ;;  %v653_v14 = vpop.f32.mrf.mxu1 }
 0x3e4   :  { %v660_v21 = vrot.slane %v653_v14, 4 }
 0x3e5   :  { %v663_v16 = vadd.f32 %v659_v13, %v625_v15 }
 0x3e6   :  { %v664_v24 = vadd.f32 %v660_v21, %v626_v22 }
 0x3e7   :  { %v1986_v17 = vmul.f32 -1.442695, %v663_v16 }
 0x3e8   :  { %v1987_v40 = vmul.f32 -1.442695, %v664_v24 }
 0x3e9   :  { %2131 = vpow2.f32 %v1986_v17 }
 0x3ea   :  { %v642_v35 = vpop.f32.mrf.mxu0 }
 0x3eb   :  { %v655_v18 = vpop.f32.mrf.mxu1 }
 0x3ec   :  { %v741_v18 = vld [vmem:[#allocation2 + $0x8] sm:$0xc0] }
 0x3ef   :  { %v2132_v19 = vpop.eup %2131 }
 0x3f0   :  { %v671_v20 = vadd.f32 1.0, %v2132_v19 }
 0x3f2   :  { %2133 = vrcp.f32 %v671_v20  ;;  %v684_v27 = vand.u32 2147483648, %v671_v20  ;;  %v682_v31 = vand.u32 2147483647, %v671_v20  ;;  %vm678_vm3 = vweird.f32 %v671_v20 }
 0x3f3   :  { %2135 = vtanh.f32 %v664_v24 }
 0x3f4   :  { %v685_v33 = vor.u32 1.1754944e-38, %v684_v27  ;;  %vm683_vm5 = vcmp.eq.f32.partialorder %v682_v31, 8.507059e+37  ;;  %2137 = vpow2.f32 %v1987_v40 }
 0x3f8   :  { %v2134_v23 = vpop.eup %2133 }
 0x3f9   :  { %v674_v25 = vmul.f32 %v2134_v23, %v671_v20  ;;  %vm679_vm2 = vweird.f32 %v2134_v23  ;;  %v2136_v37 = vpop.eup %2135 }
 0x3fa   :  { %vm680_vm4 = vmor %vm678_vm3, %vm679_vm2  ;;  %v2138_v43 = vpop.eup %2137 }
 0x3fb   :  { %v675_v26 = vsub.f32 1.0, %v674_v25  ;;  %v672_v44 = vadd.f32 1.0, %v2138_v43 }
 0x3fd   :  { %v676_v30 = vmul.f32 %v2134_v23, %v675_v26  ;;  %2139 = vrcp.f32 %v672_v44  ;;  %v699_v57 = vand.u32 2147483648, %v672_v44  ;;  %vm693_vm7 = vweird.f32 %v672_v44 }
 0x3fe   :  { %v697_v58 = vand.u32 2147483647, %v672_v44 }
 0x3ff   :  { %v677_v32 = vadd.f32 %v2134_v23, %v676_v30  ;;  %v700_v61 = vor.u32 1.1754944e-38, %v699_v57 }
 0x400   :  { %vm698_vm9 = vcmp.eq.f32.partialorder %v697_v58, 8.507059e+37 }
 0x401   :  { %v681_v34 = vsel %vm680_vm4, %v2134_v23, %v677_v32 }
 0x402   :  { %v686_v38 = vsel %vm683_vm5, %v685_v33, %v681_v34 }
 0x403   :  { %v710_v39 = vmul.f32 %v2136_v37, %v686_v38  ;;  %v2140_v45 = vpop.eup %2139  ;;  %v709_v52 = vmul.f32 %v707_v50, %v686_v38 }
 0x404   :  { %v689_v46 = vmul.f32 %v2140_v45, %v672_v44  ;;  %vm694_vm6 = vweird.f32 %v2140_v45 }
 0x405   :  { %712 = vrot.lane.b32.xlu0 %v710_v39, %s2508_s21  ;;  %vm695_vm8 = vmor %vm693_vm7, %vm694_vm6 }
 0x406   :  { %v690_v49 = vsub.f32 1.0, %v689_v46 }
 0x408   :  { %v691_v51 = vmul.f32 %v2140_v45, %v690_v49 }
 0x40a   :  { %v692_v55 = vadd.f32 %v2140_v45, %v691_v51 }
 0x40c   :  { %v696_v60 = vsel %vm695_vm8, %v2140_v45, %v692_v55 }
 0x40d   :  { %v701_v63 = vsel %vm698_vm9, %v700_v61, %v696_v60 }
 0x477   :  { %v713_v53 = vpop.permute.xlu0 %712 }
 0x478   :  { %v715_v54 = vadd.f32 %v713_v53, %v709_v52 }
 0x47a   :  { %2141 = vtanh.f32 %v715_v54  ;;  %v732_v56 = vsub.f32 %v715_v54, %v707_v50 }
 0x47c   :  { %v734_v59 = vrot.slane %v732_v56, 4 }
 0x47e   :  { %735 = vrot.lane.b32.xlu0 %v734_v59, %s2508_s21 }
 0x480   :  { %v2142_v62 = vpop.eup %2141 }
 0x481   :  { %v717_v0 = vmul.f32 %v2142_v62, %v701_v63  ;;  %v2018_v63 = vld [vmem:[#allocation16 + $0x30] sm:$0xf] }
 0x483   :  { %v724_v2 = vsub.f32 %v717_v0, %v722_v1  ;;  %v2089_v0 = vld [vmem:[#allocation16 + $0x34] sm:$0xf0]  ;;  %v2088_v1 = vld [vmem:[#allocation16 + $0x34] sm:$0xf] }
 0x485   :  { %v726_v3 = vrot.slane %v724_v2, 4  ;;  %v2755_v2 = vor.u32 %v2089_v0, %v2018_v63 }
 0x487   :  { %727 = vrot.lane.b32.xlu2 %v726_v3, %s2508_s21  ;;  %v2020_v3 = vld [vmem:[#allocation16 + $0x38] sm:$0xf0]  ;;  %913 = vmatpush.bf16.msrb.mxu0 %v2755_v2 }
 0x488   :  { %1018 = vmatpush.bf16.msrb.mxu2 %v2755_v2 }
 0x4e1   :  { %v728_v28 = vpop.permute.xlu2 %727 }
 0x4e2   :  { %v730_v5 = vmul.f32 %v728_v28, %v718_v4  ;;  %v2087_v28 = vld [vmem:[#allocation16 + $0x24] sm:$0xf0] }
 0x4e4   :  { %v2739_v29 = vadd.f32 %v730_v5, %v2727_v10  ;;  %v2757_v5 = vor.u32 %v2088_v1, %v2020_v3 }
 0x4e6   :  { %v742_v7 = vpack.c.bf16 %v2739_v29, %v2739_v29  ;;  %v835_v36 = vrot.slane %v2739_v29, 2  ;;  %926 = vmatpush.bf16.msrb.mxu1 %v2757_v5  ;;  %1031 = vmatpush.bf16.msrb.mxu3 %v2757_v5 }
 0x4e8   :  { %836 = vrot.lane.b32.xlu0 %v835_v36, %s2508_s21  ;;  %1988 = vmatmul.msk.bf16.vlgmr.msra.gmra.mxu2 %vm240_vm0, %v742_v7  ;;  %v2012_v36 = vld [vmem:[#allocation16 + $0x28] sm:$0xf0] }
 0x4e9   :  { %1989 = vmatmul.msk.bf16.vlgmr.msra.gmra.mxu3 %vm240_vm0, %v742_v7  ;;  %v2086_v7 = vld [vmem:[#allocation16 + $0x24] sm:$0xf] }
 0x4f0   :  { %v736_v41 = vpop.permute.xlu0 %735 }
 0x4f1   :  { %v738_v42 = vmul.f32 %v736_v41, %v718_v4  ;;  %v2010_v4 = vld [vmem:[#allocation16 + $0x20] sm:$0xf] }
 0x4f2   :  { %v2760_v41 = vor.u32 %v2087_v28, %v2010_v4 }
 0x4f3   :  { %v2748_v48 = vadd.f32 %v738_v42, %v2722_v47  ;;  %v2764_v42 = vor.u32 %v2086_v7, %v2012_v36 }
 0x4f4   :  { %914 = vmatpush.bf16.msrb.mxu0 %v2760_v41  ;;  %1019 = vmatpush.bf16.msrb.mxu2 %v2760_v41 }
 0x4f5   :  { %v820_v8 = vrot.slane %v2748_v48, 2  ;;  %927 = vmatpush.bf16.msrb.mxu1 %v2764_v42  ;;  %1032 = vmatpush.bf16.msrb.mxu3 %v2764_v42 }
 0x4f7   :  { %821 = vrot.lane.b32.xlu1 %v820_v8, %s2508_s21  ;;  %v2002_v8 = vld [vmem:[#allocation16 + $0x10] sm:$0xf] }
 0x55a   :  { %v837_v60 = vpop.permute.xlu0 %836 }
 0x569   :  { %v822_v43 = vpop.permute.xlu1 %821 }
 0x56b   :  { %v755_v9 = vpop.f32.mrf.mxu2 }
 0x56c   :  { %v774_v10 = vrot.slane %v755_v9, 2  ;;  %v768_v11 = vpop.f32.mrf.mxu3  ;;  %v2085_v9 = vld [vmem:[#allocation16 + $0x14] sm:$0xf0] }
 0x56d   :  { %v775_v35 = vrot.slane %v768_v11, 2  ;;  %v2004_v11 = vld [vmem:[#allocation16 + $0x18] sm:$0xf0] }
 0x56e   :  { %v778_v6 = vadd.f32 %v774_v10, %v740_v12  ;;  %v2084_v10 = vld [vmem:[#allocation16 + $0x14] sm:$0xf]  ;;  %v2768_v12 = vor.u32 %v2085_v9, %v2002_v8 }
 0x56f   :  { %v779_v19 = vadd.f32 %v775_v35, %v741_v18  ;;  %v2083_v35 = vld [vmem:[#allocation16 + $0x4] sm:$0xf0]  ;;  %v2082_v18 = vld [vmem:[#allocation16 + $0x4] sm:$0xf] }
 0x570   :  { %v1990_v13 = vmul.f32 -1.442695, %v778_v6  ;;  %v2772_v6 = vor.u32 %v2084_v10, %v2004_v11  ;;  %915 = vmatpush.bf16.msrb.mxu0 %v2768_v12  ;;  %1020 = vmatpush.bf16.msrb.mxu2 %v2768_v12 }
 0x571   :  { %v1991_v33 = vmul.f32 -1.442695, %v779_v19 }
 0x572   :  { %2143 = vpow2.f32 %v1990_v13  ;;  %928 = vmatpush.bf16.msrb.mxu1 %v2772_v6  ;;  %1033 = vmatpush.bf16.msrb.mxu3 %v2772_v6  ;;  %v833_v13 = vld [vmem:[#allocation9 + $0x6] sm:$0x3] }
 0x573   :  { %v757_v14 = vpop.f32.mrf.mxu2 }
 0x574   :  { %v770_v15 = vpop.f32.mrf.mxu3 }
 0x578   :  { %v2144_v16 = vpop.eup %2143 }
 0x579   :  { %v786_v17 = vadd.f32 1.0, %v2144_v16 }
 0x57b   :  { %2145 = vrcp.f32 %v786_v17  ;;  %v799_v22 = vand.u32 2147483648, %v786_v17  ;;  %v797_v24 = vand.u32 2147483647, %v786_v17  ;;  %vm793_vm11 = vweird.f32 %v786_v17 }
 0x57c   :  { %2147 = vtanh.f32 %v779_v19  ;;  %v1996_v19 = vld [vmem:[#allocation16 + $0x8] sm:$0xf0] }
 0x57d   :  { %v800_v26 = vor.u32 1.1754944e-38, %v799_v22  ;;  %vm798_vm13 = vcmp.eq.f32.partialorder %v797_v24, 8.507059e+37  ;;  %2149 = vpow2.f32 %v1991_v33 }
 0x581   :  { %v2146_v47 = vpop.eup %2145 }
 0x582   :  { %v789_v20 = vmul.f32 %v2146_v47, %v786_v17  ;;  %vm794_vm10 = vweird.f32 %v2146_v47  ;;  %v2148_v30 = vpop.eup %2147  ;;  %v1994_v17 = vld [vmem:[#allocation16] sm:$0xf] }
 0x583   :  { %vm795_vm12 = vmor %vm793_vm11, %vm794_vm10  ;;  %v2150_v34 = vpop.eup %2149 }
 0x584   :  { %v790_v21 = vsub.f32 1.0, %v789_v20  ;;  %v787_v37 = vadd.f32 1.0, %v2150_v34  ;;  %v2786_v20 = vor.u32 %v2082_v18, %v1996_v19  ;;  %v864_v34 = vld [vmem:[#allocation3 + $0x10] sm:$0x3] }
 0x586   :  { %v791_v23 = vmul.f32 %v2146_v47, %v790_v21  ;;  %2151 = vrcp.f32 %v787_v37  ;;  %v814_v52 = vand.u32 2147483648, %v787_v37  ;;  %vm808_vm15 = vweird.f32 %v787_v37  ;;  %929 = vmatpush.bf16.msrb.mxu1 %v2786_v20  ;;  %1034 = vmatpush.bf16.msrb.mxu3 %v2786_v20 }
 0x587   :  { %v812_v53 = vand.u32 2147483647, %v787_v37 }
 0x588   :  { %v792_v25 = vadd.f32 %v2146_v47, %v791_v23  ;;  %v815_v56 = vor.u32 1.1754944e-38, %v814_v52 }
 0x589   :  { %vm813_vm2 = vcmp.eq.f32.partialorder %v812_v53, 8.507059e+37 }
 0x58a   :  { %v796_v27 = vsel %vm795_vm12, %v2146_v47, %v792_v25  ;;  %v2784_v47 = vor.u32 %v2083_v35, %v1994_v17  ;;  %1146 = vmatpush.bf16.msra.mxu1 %v2757_v5  ;;  %1261 = vmatpush.bf16.msra.mxu3 %v2757_v5 }
 0x58b   :  { %v801_v31 = vsel %vm798_vm13, %v800_v26, %v796_v27 }
 0x58c   :  { %v825_v32 = vmul.f32 %v2148_v30, %v801_v31  ;;  %v2152_v38 = vpop.eup %2151  ;;  %v824_v45 = vmul.f32 %v822_v43, %v801_v31  ;;  %916 = vmatpush.bf16.msrb.mxu0 %v2784_v47  ;;  %1021 = vmatpush.bf16.msrb.mxu2 %v2784_v47 }
 0x58d   :  { %v804_v39 = vmul.f32 %v2152_v38, %v787_v37  ;;  %vm809_vm14 = vweird.f32 %v2152_v38 }
 0x58e   :  { %827 = vrot.lane.b32.xlu2 %v825_v32, %s2508_s21  ;;  %vm810_vm1 = vmor %vm808_vm15, %vm809_vm14  ;;  %1147 = vmatpush.bf16.msra.mxu1 %v2764_v42 }
 0x58f   :  { %v805_v40 = vsub.f32 1.0, %v804_v39  ;;  %1262 = vmatpush.bf16.msra.mxu3 %v2764_v42 }
 0x590   :  { %1133 = vmatpush.bf16.msra.mxu0 %v2755_v2  ;;  %1248 = vmatpush.bf16.msra.mxu2 %v2755_v2 }
 0x591   :  { %v806_v44 = vmul.f32 %v2152_v38, %v805_v40 }
 0x592   :  { %1148 = vmatpush.bf16.msra.mxu1 %v2772_v6 }
 0x593   :  { %v807_v50 = vadd.f32 %v2152_v38, %v806_v44  ;;  %1263 = vmatpush.bf16.msra.mxu3 %v2772_v6 }
 0x594   :  { %1134 = vmatpush.bf16.msra.mxu0 %v2760_v41  ;;  %1249 = vmatpush.bf16.msra.mxu2 %v2760_v41 }
 0x595   :  { %v811_v55 = vsel %vm810_vm1, %v2152_v38, %v807_v50 }
 0x596   :  { %v816_v58 = vsel %vm813_vm2, %v815_v56, %v811_v55  ;;  %1149 = vmatpush.bf16.msra.mxu1 %v2786_v20 }
 0x597   :  { %1264 = vmatpush.bf16.msra.mxu3 %v2786_v20 }
 0x598   :  { %1135 = vmatpush.bf16.msra.mxu0 %v2768_v12  ;;  %1250 = vmatpush.bf16.msra.mxu2 %v2768_v12 }
 0x59c   :  { %1136 = vmatpush.bf16.msra.mxu0 %v2784_v47  ;;  %1251 = vmatpush.bf16.msra.mxu2 %v2784_v47 }
 0x5e8   :  { %v828_v46 = vpop.permute.xlu2 %827 }
 0x5e9   :  { %v830_v49 = vadd.f32 %v828_v46, %v824_v45 }
 0x5eb   :  { %2153 = vtanh.f32 %v830_v49  ;;  %v847_v51 = vsub.f32 %v830_v49, %v822_v43 }
 0x5ed   :  { %v849_v54 = vrot.slane %v847_v51, 6 }
 0x5ef   :  { %850 = vrot.lane.b32.xlu2 %v849_v54, %s2508_s21 }
 0x5f1   :  { %v2154_v57 = vpop.eup %2153 }
 0x5f2   :  { %v832_v59 = vmul.f32 %v2154_v57, %v816_v58 }
 0x5f4   :  { %v839_v61 = vsub.f32 %v832_v59, %v837_v60 }
 0x5f6   :  { %v841_v62 = vrot.slane %v839_v61, 6 }
 0x5f8   :  { %842 = vrot.lane.b32.xlu1 %v841_v62, %s2508_s21 }
 0x649   :  { %v851_v14 = vpop.permute.xlu2 %850 }
 0x64a   :  { %v853_v15 = vmul.f32 %v851_v14, %v833_v13  ;;  %v989_v14 = vld [vmem:[#allocation10] sm:$0x3] }
 0x64c   :  { %v2780_v16 = vadd.f32 %v853_v15, %v2748_v48 }
 0x64e   :  { %977 = vrot.lane.b32.xlu0 %v2780_v16, %s2508_s21 }
 0x66a   :  { %v843_v48 = vpop.permute.xlu1 %842 }
 0x66b   :  { %v845_v21 = vmul.f32 %v843_v48, %v833_v13 }
 0x66d   :  { %v2809_v22 = vadd.f32 %v845_v21, %v2739_v29  ;;  %v863_v29 = vld [vmem:[#allocation3 + $0x8] sm:$0x3] }
 0x66f   :  { %v865_v23 = vpack.c.bf16 %v2809_v22, %v2809_v22  ;;  %991 = vrot.lane.b32.xlu2 %v2809_v22, %s2508_s21 }
 0x671   :  { %2024 = vmatmul.msk.bf16.vlgmr.msrb.gmra.mxu0 %vm240_vm0, %v865_v23  ;;  %2025 = vmatmul.msk.bf16.vlgmr.msrb.gmra.mxu1 %vm240_vm0, %v865_v23 }
 0x672   :  { %1363 = vmatpush.bf16.msrb.mxu0 %v2755_v2  ;;  %1376 = vmatpush.bf16.msrb.mxu1 %v2757_v5 }
 0x676   :  { %1364 = vmatpush.bf16.msrb.mxu0 %v2760_v41  ;;  %1377 = vmatpush.bf16.msrb.mxu1 %v2764_v42 }
 0x67a   :  { %1365 = vmatpush.bf16.msrb.mxu0 %v2768_v12  ;;  %1378 = vmatpush.bf16.msrb.mxu1 %v2772_v6 }
 0x67e   :  { %1366 = vmatpush.bf16.msrb.mxu0 %v2784_v47  ;;  %1379 = vmatpush.bf16.msrb.mxu1 %v2786_v20 }
 0x6c0   :  { %v978_v60 = vpop.permute.xlu0 %977 }
 0x6c9   :  { %v992_v11 = vpop.permute.xlu2 %991 }
 0x6ee   :  { %v918_v24 = vpop.f32.mrf.mxu0  ;;  %v931_v25 = vpop.f32.mrf.mxu1 }
 0x6ef   :  { %v935_v26 = vadd.f32 %v918_v24, %v863_v29  ;;  %v936_v38 = vadd.f32 %v931_v25, %v864_v34  ;;  %v1008_v25 = vld [vmem:[#allocation3 + $0x8] sm:$0xc] }
 0x6f1   :  { %v2026_v27 = vmul.f32 -1.442695, %v935_v26  ;;  %v2027_v54 = vmul.f32 -1.442695, %v936_v38 }
 0x6f3   :  { %2155 = vpow2.f32 %v2026_v27 }
 0x6f6   :  { %v920_v30 = vpop.f32.mrf.mxu0  ;;  %v933_v31 = vpop.f32.mrf.mxu1 }
 0x6f9   :  { %v2156_v32 = vpop.eup %2155 }
 0x6fa   :  { %v943_v33 = vadd.f32 1.0, %v2156_v32 }
 0x6fc   :  { %2157 = vrcp.f32 %v943_v33  ;;  %v956_v43 = vand.u32 2147483648, %v943_v33  ;;  %v954_v45 = vand.u32 2147483647, %v943_v33  ;;  %vm950_vm4 = vweird.f32 %v943_v33 }
 0x6fd   :  { %2159 = vtanh.f32 %v936_v38 }
 0x6fe   :  { %v957_v49 = vor.u32 1.1754944e-38, %v956_v43  ;;  %vm955_vm6 = vcmp.eq.f32.partialorder %v954_v45, 8.507059e+37  ;;  %2161 = vpow2.f32 %v2027_v54 }
 0x702   :  { %v2158_v37 = vpop.eup %2157 }
 0x703   :  { %v946_v39 = vmul.f32 %v2158_v37, %v943_v33  ;;  %vm951_vm3 = vweird.f32 %v2158_v37  ;;  %v2160_v51 = vpop.eup %2159 }
 0x704   :  { %vm952_vm5 = vmor %vm950_vm4, %vm951_vm3  ;;  %v2162_v55 = vpop.eup %2161 }
 0x705   :  { %v947_v40 = vsub.f32 1.0, %v946_v39  ;;  %v944_v56 = vadd.f32 1.0, %v2162_v55 }
 0x707   :  { %v948_v44 = vmul.f32 %v2158_v37, %v947_v40  ;;  %2163 = vrcp.f32 %v944_v56  ;;  %v971_v4 = vand.u32 2147483648, %v944_v56  ;;  %vm965_vm8 = vweird.f32 %v944_v56 }
 0x708   :  { %v969_v28 = vand.u32 2147483647, %v944_v56 }
 0x709   :  { %v949_v46 = vadd.f32 %v2158_v37, %v948_v44  ;;  %v972_v36 = vor.u32 1.1754944e-38, %v971_v4 }
 0x70a   :  { %vm970_vm10 = vcmp.eq.f32.partialorder %v969_v28, 8.507059e+37 }
 0x70b   :  { %v953_v50 = vsel %vm952_vm5, %v2158_v37, %v949_v46  ;;  %v1009_v37 = vld [vmem:[#allocation3 + $0x10] sm:$0xc] }
 0x70c   :  { %v958_v52 = vsel %vm955_vm6, %v957_v49, %v953_v50 }
 0x70d   :  { %v981_v53 = vmul.f32 %v2160_v51, %v958_v52  ;;  %v2164_v57 = vpop.eup %2163  ;;  %v980_v62 = vmul.f32 %v978_v60, %v958_v52 }
 0x70e   :  { %v961_v58 = vmul.f32 %v2164_v57, %v944_v56  ;;  %vm966_vm7 = vweird.f32 %v2164_v57 }
 0x70f   :  { %983 = vrot.lane.b32.xlu1 %v981_v53, %s2508_s21  ;;  %vm967_vm9 = vmor %vm965_vm8, %vm966_vm7 }
 0x710   :  { %v962_v59 = vsub.f32 1.0, %v961_v58 }
 0x712   :  { %v963_v61 = vmul.f32 %v2164_v57, %v962_v59 }
 0x714   :  { %v964_v1 = vadd.f32 %v2164_v57, %v963_v61 }
 0x716   :  { %v968_v7 = vsel %vm967_vm9, %v2164_v57, %v964_v1 }
 0x717   :  { %v973_v9 = vsel %vm970_vm10, %v972_v36, %v968_v7 }
 0x781   :  { %v984_v63 = vpop.permute.xlu1 %983 }
 0x782   :  { %v986_v0 = vadd.f32 %v984_v63, %v980_v62 }
 0x784   :  { %2165 = vtanh.f32 %v986_v0  ;;  %v1001_v3 = vsub.f32 %v986_v0, %v978_v60 }
 0x786   :  { %1003 = vrot.lane.b32.xlu1 %v1001_v3, %s2508_s21 }
 0x78a   :  { %v2166_v8 = vpop.eup %2165 }
 0x78b   :  { %v988_v10 = vmul.f32 %v2166_v8, %v973_v9 }
 0x78d   :  { %v994_v13 = vsub.f32 %v988_v10, %v992_v11 }
 0x78f   :  { %996 = vrot.lane.b32.xlu0 %v994_v13, %s2508_s21 }
 0x7f8   :  { %v1004_v15 = vpop.permute.xlu1 %1003 }
 0x7f9   :  { %v1006_v17 = vmul.f32 %v1004_v15, %v989_v14 }
 0x7fb   :  { %v2829_v35 = vadd.f32 %v1006_v17, %v2780_v16 }
 0x7fd   :  { %v1088_v18 = vrot.slane %v2829_v35, 6 }
 0x7ff   :  { %1089 = vrot.lane.b32.xlu2 %v1088_v18, %s2508_s21  ;;  %v1101_v18 = vld [vmem:[#allocation10 + $0x2] sm:$0x3] }
 0x801   :  { %v997_v19 = vpop.permute.xlu0 %996 }
 0x802   :  { %v999_v48 = vmul.f32 %v997_v19, %v989_v14 }
 0x804   :  { %v2834_v21 = vadd.f32 %v999_v48, %v2809_v22 }
 0x806   :  { %v1010_v23 = vpack.c.bf16 %v2834_v21, %v2834_v21  ;;  %v1103_v29 = vrot.slane %v2834_v21, 6 }
 0x808   :  { %1104 = vrot.lane.b32.xlu1 %v1103_v29, %s2508_s21  ;;  %2028 = vmatmul.msk.bf16.vlgmr.msrb.gmra.mxu2 %vm240_vm0, %v1010_v23 }
 0x809   :  { %2029 = vmatmul.msk.bf16.vlgmr.msrb.gmra.mxu3 %vm240_vm0, %v1010_v23  ;;  %1468 = vmatpush.bf16.msrb.mxu2 %v2755_v2 }
 0x80a   :  { %1481 = vmatpush.bf16.msrb.mxu3 %v2757_v5 }
 0x80d   :  { %1469 = vmatpush.bf16.msrb.mxu2 %v2760_v41 }
 0x80e   :  { %1482 = vmatpush.bf16.msrb.mxu3 %v2764_v42 }
 0x811   :  { %1470 = vmatpush.bf16.msrb.mxu2 %v2768_v12 }
 0x812   :  { %1483 = vmatpush.bf16.msrb.mxu3 %v2772_v6 }
 0x815   :  { %1471 = vmatpush.bf16.msrb.mxu2 %v2784_v47 }
 0x816   :  { %1484 = vmatpush.bf16.msrb.mxu3 %v2786_v20 }
 0x859   :  { %v1090_v61 = vpop.permute.xlu2 %1089 }
 0x87a   :  { %v1105_v14 = vpop.permute.xlu1 %1104 }
 0x88b   :  { %v1023_v16 = vpop.f32.mrf.mxu2 }
 0x88c   :  { %v1042_v22 = vrot.slane %v1023_v16, 6  ;;  %v1036_v24 = vpop.f32.mrf.mxu3 }
 0x88d   :  { %v1043_v34 = vrot.slane %v1036_v24, 6 }
 0x88e   :  { %v1046_v26 = vadd.f32 %v1042_v22, %v1008_v25 }
 0x88f   :  { %v1047_v39 = vadd.f32 %v1043_v34, %v1009_v37 }
 0x890   :  { %v2030_v27 = vmul.f32 -1.442695, %v1046_v26 }
 0x891   :  { %v2031_v55 = vmul.f32 -1.442695, %v1047_v39 }
 0x892   :  { %2167 = vpow2.f32 %v2030_v27 }
 0x893   :  { %v1025_v30 = vpop.f32.mrf.mxu2 }
 0x894   :  { %v1038_v31 = vpop.f32.mrf.mxu3 }
 0x895   :  { %v1123_v31 = vld [vmem:[#allocation3 + $0x8] sm:$0x30] }
 0x898   :  { %v2168_v32 = vpop.eup %2167 }
 0x899   :  { %v1054_v33 = vadd.f32 1.0, %v2168_v32 }
 0x89b   :  { %2169 = vrcp.f32 %v1054_v33  ;;  %v1067_v44 = vand.u32 2147483648, %v1054_v33  ;;  %v1065_v46 = vand.u32 2147483647, %v1054_v33  ;;  %vm1061_vm12 = vweird.f32 %v1054_v33 }
 0x89c   :  { %2171 = vtanh.f32 %v1047_v39 }
 0x89d   :  { %v1068_v50 = vor.u32 1.1754944e-38, %v1067_v44  ;;  %vm1066_vm14 = vcmp.eq.f32.partialorder %v1065_v46, 8.507059e+37  ;;  %2173 = vpow2.f32 %v2031_v55 }
 0x8a1   :  { %v2170_v38 = vpop.eup %2169 }
 0x8a2   :  { %v1057_v40 = vmul.f32 %v2170_v38, %v1054_v33  ;;  %vm1062_vm11 = vweird.f32 %v2170_v38  ;;  %v2172_v52 = vpop.eup %2171 }
 0x8a3   :  { %vm1063_vm13 = vmor %vm1061_vm12, %vm1062_vm11  ;;  %v2174_v56 = vpop.eup %2173 }
 0x8a4   :  { %v1058_v43 = vsub.f32 1.0, %v1057_v40  ;;  %v1055_v57 = vadd.f32 1.0, %v2174_v56  ;;  %v1124_v40 = vld [vmem:[#allocation3 + $0x10] sm:$0x30] }
 0x8a6   :  { %v1059_v45 = vmul.f32 %v2170_v38, %v1058_v43  ;;  %2175 = vrcp.f32 %v1055_v57  ;;  %v1082_v28 = vand.u32 2147483648, %v1055_v57  ;;  %vm1076_vm1 = vweird.f32 %v1055_v57 }
 0x8a7   :  { %v1080_v7 = vand.u32 2147483647, %v1055_v57 }
 0x8a8   :  { %v1060_v49 = vadd.f32 %v2170_v38, %v1059_v45  ;;  %v1083_v9 = vor.u32 1.1754944e-38, %v1082_v28 }
 0x8a9   :  { %vm1081_vm3 = vcmp.eq.f32.partialorder %v1080_v7, 8.507059e+37 }
 0x8aa   :  { %v1064_v51 = vsel %vm1063_vm13, %v2170_v38, %v1060_v49 }
 0x8ab   :  { %v1069_v53 = vsel %vm1066_vm14, %v1068_v50, %v1064_v51 }
 0x8ac   :  { %v1093_v54 = vmul.f32 %v2172_v52, %v1069_v53  ;;  %v2176_v58 = vpop.eup %2175  ;;  %v1092_v63 = vmul.f32 %v1090_v61, %v1069_v53 }
 0x8ad   :  { %v1072_v59 = vmul.f32 %v2176_v58, %v1055_v57  ;;  %vm1077_vm15 = vweird.f32 %v2176_v58 }
 0x8ae   :  { %1095 = vrot.lane.b32.xlu0 %v1093_v54, %s2508_s21  ;;  %vm1078_vm2 = vmor %vm1076_vm1, %vm1077_vm15 }
 0x8af   :  { %v1073_v60 = vsub.f32 1.0, %v1072_v59 }
 0x8b1   :  { %v1074_v62 = vmul.f32 %v2176_v58, %v1073_v60 }
 0x8b3   :  { %v1075_v3 = vadd.f32 %v2176_v58, %v1074_v62 }
 0x8b5   :  { %v1079_v8 = vsel %vm1078_vm2, %v2176_v58, %v1075_v3 }
 0x8b6   :  { %v1084_v11 = vsel %vm1081_vm3, %v1083_v9, %v1079_v8 }
 0x920   :  { %v1096_v0 = vpop.permute.xlu0 %1095 }
 0x921   :  { %v1098_v1 = vadd.f32 %v1096_v0, %v1092_v63 }
 0x923   :  { %2177 = vtanh.f32 %v1098_v1  ;;  %v1115_v4 = vsub.f32 %v1098_v1, %v1090_v61 }
 0x925   :  { %v1117_v36 = vrot.slane %v1115_v4, 2 }
 0x927   :  { %1118 = vrot.lane.b32.xlu0 %v1117_v36, %s2508_s21 }
 0x929   :  { %v2178_v10 = vpop.eup %2177 }
 0x92a   :  { %v1100_v13 = vmul.f32 %v2178_v10, %v1084_v11 }
 0x92c   :  { %v1107_v15 = vsub.f32 %v1100_v13, %v1105_v14 }
 0x92e   :  { %v1109_v17 = vrot.slane %v1107_v15, 2 }
 0x930   :  { %1110 = vrot.lane.b32.xlu2 %v1109_v17, %s2508_s21 }
 0x98a   :  { %v1111_v19 = vpop.permute.xlu2 %1110 }
 0x98b   :  { %v1113_v48 = vmul.f32 %v1111_v19, %v1101_v18 }
 0x98d   :  { %v2854_v23 = vadd.f32 %v1113_v48, %v2834_v21 }
 0x98f   :  { %v1125_v29 = vpack.c.bf16 %v2854_v23, %v2854_v23  ;;  %v1218_v16 = vrot.slane %v2854_v23, 4 }
 0x991   :  { %1219 = vrot.lane.b32.xlu0 %v1218_v16, %s2508_s21  ;;  %2032 = vmatmul.msk.bf16.vlgmr.msra.gmra.mxu0 %vm240_vm0, %v1125_v29 }
 0x992   :  { %2033 = vmatmul.msk.bf16.vlgmr.msra.gmra.mxu1 %vm240_vm0, %v1125_v29  ;;  %1583 = vmatpush.bf16.msra.mxu0 %v2755_v2  ;;  %v1216_v29 = vld [vmem:[#allocation10 + $0x4] sm:$0x3] }
 0x993   :  { %1596 = vmatpush.bf16.msra.mxu1 %v2757_v5 }
 0x996   :  { %1584 = vmatpush.bf16.msra.mxu0 %v2760_v41 }
 0x997   :  { %1597 = vmatpush.bf16.msra.mxu1 %v2764_v42 }
 0x999   :  { %v1119_v21 = vpop.permute.xlu0 %1118 }
 0x99a   :  { %v1121_v22 = vmul.f32 %v1119_v21, %v1101_v18  ;;  %1585 = vmatpush.bf16.msra.mxu0 %v2768_v12 }
 0x99b   :  { %1598 = vmatpush.bf16.msra.mxu1 %v2772_v6 }
 0x99c   :  { %v2869_v24 = vadd.f32 %v1121_v22, %v2829_v35 }
 0x99e   :  { %v1203_v25 = vrot.slane %v2869_v24, 4  ;;  %1586 = vmatpush.bf16.msra.mxu0 %v2784_v47 }
 0x99f   :  { %1599 = vmatpush.bf16.msra.mxu1 %v2786_v20 }
 0x9a0   :  { %1204 = vrot.lane.b32.xlu1 %v1203_v25, %s2508_s21 }
 0xa03   :  { %v1220_v18 = vpop.permute.xlu0 %1219 }
 0xa0e   :  { %v1138_v26 = vpop.f32.mrf.mxu0 }
 0xa0f   :  { %v1157_v27 = vrot.slane %v1138_v26, 4  ;;  %v1151_v30 = vpop.f32.mrf.mxu1 }
 0xa10   :  { %v1158_v39 = vrot.slane %v1151_v30, 4 }
 0xa11   :  { %v1161_v32 = vadd.f32 %v1157_v27, %v1123_v31 }
 0xa12   :  { %v1162_v44 = vadd.f32 %v1158_v39, %v1124_v40  ;;  %v1205_v0 = vpop.permute.xlu1 %1204 }
 0xa13   :  { %v2034_v33 = vmul.f32 -1.442695, %v1161_v32 }
 0xa14   :  { %v2035_v58 = vmul.f32 -1.442695, %v1162_v44 }
 0xa15   :  { %2179 = vpow2.f32 %v2034_v33 }
 0xa16   :  { %v1140_v34 = vpop.f32.mrf.mxu0 }
 0xa17   :  { %v1153_v37 = vpop.f32.mrf.mxu1  ;;  %v1238_v34 = vld [vmem:[#allocation3 + $0x8] sm:$0xc0] }
 0xa1b   :  { %v2180_v38 = vpop.eup %2179 }
 0xa1c   :  { %v1169_v35 = vadd.f32 1.0, %v2180_v38 }
 0xa1e   :  { %2181 = vrcp.f32 %v1169_v35  ;;  %v1182_v49 = vand.u32 2147483648, %v1169_v35  ;;  %v1180_v51 = vand.u32 2147483647, %v1169_v35  ;;  %vm1176_vm5 = vweird.f32 %v1169_v35 }
 0xa1f   :  { %2183 = vtanh.f32 %v1162_v44 }
 0xa20   :  { %v1183_v53 = vor.u32 1.1754944e-38, %v1182_v49  ;;  %vm1181_vm7 = vcmp.eq.f32.partialorder %v1180_v51, 8.507059e+37  ;;  %2185 = vpow2.f32 %v2035_v58 }
 0xa24   :  { %v2182_v43 = vpop.eup %2181 }
 0xa25   :  { %v1172_v45 = vmul.f32 %v2182_v43, %v1169_v35  ;;  %vm1177_vm4 = vweird.f32 %v2182_v43  ;;  %v2184_v55 = vpop.eup %2183 }
 0xa26   :  { %vm1178_vm6 = vmor %vm1176_vm5, %vm1177_vm4  ;;  %v2186_v59 = vpop.eup %2185 }
 0xa27   :  { %v1173_v46 = vsub.f32 1.0, %v1172_v45  ;;  %v1170_v60 = vadd.f32 1.0, %v2186_v59 }
 0xa29   :  { %v1174_v50 = vmul.f32 %v2182_v43, %v1173_v46  ;;  %2187 = vrcp.f32 %v1170_v60  ;;  %v1197_v8 = vand.u32 2147483648, %v1170_v60  ;;  %vm1191_vm9 = vweird.f32 %v1170_v60 }
 0xa2a   :  { %v1195_v9 = vand.u32 2147483647, %v1170_v60 }
 0xa2b   :  { %v1175_v52 = vadd.f32 %v2182_v43, %v1174_v50  ;;  %v1198_v13 = vor.u32 1.1754944e-38, %v1197_v8 }
 0xa2c   :  { %vm1196_vm11 = vcmp.eq.f32.partialorder %v1195_v9, 8.507059e+37 }
 0xa2d   :  { %v1179_v54 = vsel %vm1178_vm6, %v2182_v43, %v1175_v52 }
 0xa2e   :  { %v1184_v56 = vsel %vm1181_vm7, %v1183_v53, %v1179_v54 }
 0xa2f   :  { %v1208_v57 = vmul.f32 %v2184_v55, %v1184_v56  ;;  %v2188_v61 = vpop.eup %2187  ;;  %v1207_v3 = vmul.f32 %v1205_v0, %v1184_v56 }
 0xa30   :  { %v1187_v62 = vmul.f32 %v2188_v61, %v1170_v60  ;;  %vm1192_vm8 = vweird.f32 %v2188_v61 }
 0xa31   :  { %1210 = vrot.lane.b32.xlu2 %v1208_v57, %s2508_s21  ;;  %vm1193_vm10 = vmor %vm1191_vm9, %vm1192_vm8 }
 0xa32   :  { %v1188_v63 = vsub.f32 1.0, %v1187_v62 }
 0xa34   :  { %v1189_v1 = vmul.f32 %v2188_v61, %v1188_v63 }
 0xa36   :  { %v1190_v7 = vadd.f32 %v2188_v61, %v1189_v1 }
 0xa38   :  { %v1194_v11 = vsel %vm1193_vm10, %v2188_v61, %v1190_v7 }
 0xa39   :  { %v1199_v15 = vsel %vm1196_vm11, %v1198_v13, %v1194_v11 }
 0xa8b   :  { %v1211_v4 = vpop.permute.xlu2 %1210 }
 0xa8c   :  { %v1213_v28 = vadd.f32 %v1211_v4, %v1207_v3 }
 0xa8e   :  { %2189 = vtanh.f32 %v1213_v28  ;;  %v1230_v36 = vsub.f32 %v1213_v28, %v1205_v0 }
 0xa90   :  { %v1232_v10 = vrot.slane %v1230_v36, 4 }
 0xa92   :  { %1233 = vrot.lane.b32.xlu2 %v1232_v10, %s2508_s21 }
 0xa94   :  { %v2190_v14 = vpop.eup %2189 }
 0xa95   :  { %v1215_v17 = vmul.f32 %v2190_v14, %v1199_v15  ;;  %v1331_v15 = vld [vmem:[#allocation10 + $0x6] sm:$0x3] }
 0xa97   :  { %v1222_v19 = vsub.f32 %v1215_v17, %v1220_v18 }
 0xa99   :  { %v1224_v48 = vrot.slane %v1222_v19, 4 }
 0xa9b   :  { %1225 = vrot.lane.b32.xlu1 %v1224_v48, %s2508_s21 }
 0xaec   :  { %v1234_v16 = vpop.permute.xlu2 %1233 }
 0xaed   :  { %v1236_v21 = vmul.f32 %v1234_v16, %v1216_v29 }
 0xaef   :  { %v2879_v22 = vadd.f32 %v1236_v21, %v2869_v24 }
 0xaf1   :  { %v1318_v25 = vrot.slane %v2879_v22, 2 }
 0xaf3   :  { %1319 = vrot.lane.b32.xlu0 %v1318_v25, %s2508_s21 }
 0xb0d   :  { %v1226_v26 = vpop.permute.xlu1 %1225 }
 0xb0e   :  { %v1228_v27 = vmul.f32 %v1226_v26, %v1216_v29 }
 0xb10   :  { %v2884_v30 = vadd.f32 %v1228_v27, %v2854_v23 }
 0xb12   :  { %v1240_v31 = vpack.c.bf16 %v2884_v30, %v2884_v30  ;;  %v1333_v32 = vrot.slane %v2884_v30, 2 }
 0xb14   :  { %1334 = vrot.lane.b32.xlu2 %v1333_v32, %s2508_s21  ;;  %2036 = vmatmul.msk.bf16.vlgmr.msra.gmra.mxu2 %vm240_vm0, %v1240_v31 }
 0xb15   :  { %2037 = vmatmul.msk.bf16.vlgmr.msra.gmra.mxu3 %vm240_vm0, %v1240_v31  ;;  %1698 = vmatpush.bf16.msra.mxu2 %v2755_v2 }
 0xb16   :  { %1711 = vmatpush.bf16.msra.mxu3 %v2757_v5 }
 0xb19   :  { %1699 = vmatpush.bf16.msra.mxu2 %v2760_v41 }
 0xb1a   :  { %1712 = vmatpush.bf16.msra.mxu3 %v2764_v42 }
 0xb1d   :  { %1700 = vmatpush.bf16.msra.mxu2 %v2768_v12  ;;  %v1239_v12 = vld [vmem:[#allocation3 + $0x10] sm:$0xc0] }
 0xb1e   :  { %1713 = vmatpush.bf16.msra.mxu3 %v2772_v6 }
 0xb21   :  { %1701 = vmatpush.bf16.msra.mxu2 %v2784_v47 }
 0xb22   :  { %1714 = vmatpush.bf16.msra.mxu3 %v2786_v20 }
 0xb65   :  { %v1320_v59 = vpop.permute.xlu0 %1319 }
 0xb6e   :  { %v1335_v11 = vpop.permute.xlu2 %1334 }
 0xb97   :  { %v1253_v23 = vpop.f32.mrf.mxu2 }
 0xb98   :  { %v1272_v24 = vrot.slane %v1253_v23, 2  ;;  %v1266_v33 = vpop.f32.mrf.mxu3 }
 0xb99   :  { %v1273_v42 = vrot.slane %v1266_v33, 2  ;;  %v1354_v33 = vld [vmem:[#allocation3 + $0x18] sm:$0x3] }
 0xb9a   :  { %v1276_v37 = vadd.f32 %v1272_v24, %v1238_v34 }
 0xb9b   :  { %v1277_v6 = vadd.f32 %v1273_v42, %v1239_v12 }
 0xb9c   :  { %v2038_v2 = vmul.f32 -1.442695, %v1276_v37 }
 0xb9d   :  { %v2039_v53 = vmul.f32 -1.442695, %v1277_v6 }
 0xb9e   :  { %2191 = vpow2.f32 %v2038_v2 }
 0xb9f   :  { %v1255_v5 = vpop.f32.mrf.mxu2 }
 0xba0   :  { %v1268_v38 = vpop.f32.mrf.mxu3 }
 0xba4   :  { %v2192_v41 = vpop.eup %2191 }
 0xba5   :  { %v1284_v35 = vadd.f32 1.0, %v2192_v41 }
 0xba7   :  { %2193 = vrcp.f32 %v1284_v35  ;;  %v1297_v20 = vand.u32 2147483648, %v1284_v35  ;;  %v1295_v44 = vand.u32 2147483647, %v1284_v35  ;;  %vm1291_vm13 = vweird.f32 %v1284_v35 }
 0xba8   :  { %2195 = vtanh.f32 %v1277_v6 }
 0xba9   :  { %v1298_v46 = vor.u32 1.1754944e-38, %v1297_v20  ;;  %vm1296_vm15 = vcmp.eq.f32.partialorder %v1295_v44, 8.507059e+37  ;;  %2197 = vpow2.f32 %v2039_v53 }
 0xbad   :  { %v2194_v39 = vpop.eup %2193 }
 0xbae   :  { %v1287_v40 = vmul.f32 %v2194_v39, %v1284_v35  ;;  %vm1292_vm12 = vweird.f32 %v2194_v39  ;;  %v2196_v50 = vpop.eup %2195 }
 0xbaf   :  { %vm1293_vm14 = vmor %vm1291_vm13, %vm1292_vm12  ;;  %v2198_v54 = vpop.eup %2197 }
 0xbb0   :  { %v1288_v47 = vsub.f32 1.0, %v1287_v40  ;;  %v1285_v55 = vadd.f32 1.0, %v2198_v54 }
 0xbb2   :  { %v1289_v43 = vmul.f32 %v2194_v39, %v1288_v47  ;;  %2199 = vrcp.f32 %v1285_v55  ;;  %v1312_v3 = vand.u32 2147483648, %v1285_v55  ;;  %vm1306_vm2 = vweird.f32 %v1285_v55 }
 0xbb3   :  { %v1310_v4 = vand.u32 2147483647, %v1285_v55 }
 0xbb4   :  { %v1290_v45 = vadd.f32 %v2194_v39, %v1289_v43  ;;  %v1313_v36 = vor.u32 1.1754944e-38, %v1312_v3  ;;  %v1439_v3 = vld [vmem:[#allocation10 + $0x8] sm:$0x3] }
 0xbb5   :  { %vm1311_vm4 = vcmp.eq.f32.partialorder %v1310_v4, 8.507059e+37 }
 0xbb6   :  { %v1294_v49 = vsel %vm1293_vm14, %v2194_v39, %v1290_v45 }
 0xbb7   :  { %v1299_v51 = vsel %vm1296_vm15, %v1298_v46, %v1294_v49 }
 0xbb8   :  { %v1323_v52 = vmul.f32 %v2196_v50, %v1299_v51  ;;  %v2200_v56 = vpop.eup %2199  ;;  %v1322_v61 = vmul.f32 %v1320_v59, %v1299_v51 }
 0xbb9   :  { %v1302_v57 = vmul.f32 %v2200_v56, %v1285_v55  ;;  %vm1307_vm1 = vweird.f32 %v2200_v56 }
 0xbba   :  { %1325 = vrot.lane.b32.xlu1 %v1323_v52, %s2508_s21  ;;  %vm1308_vm3 = vmor %vm1306_vm2, %vm1307_vm1 }
 0xbbb   :  { %v1303_v58 = vsub.f32 1.0, %v1302_v57 }
 0xbbd   :  { %v1304_v60 = vmul.f32 %v2200_v56, %v1303_v58 }
 0xbbf   :  { %v1305_v0 = vadd.f32 %v2200_v56, %v1304_v60 }
 0xbc1   :  { %v1309_v7 = vsel %vm1308_vm3, %v2200_v56, %v1305_v0 }
 0xbc2   :  { %v1314_v9 = vsel %vm1311_vm4, %v1313_v36, %v1309_v7 }
 0xc2c   :  { %v1326_v62 = vpop.permute.xlu1 %1325 }
 0xc2d   :  { %v1328_v63 = vadd.f32 %v1326_v62, %v1322_v61 }
 0xc2f   :  { %2201 = vtanh.f32 %v1328_v63  ;;  %v1345_v1 = vsub.f32 %v1328_v63, %v1320_v59 }
 0xc31   :  { %v1347_v28 = vrot.slane %v1345_v1, 6 }
 0xc33   :  { %1348 = vrot.lane.b32.xlu1 %v1347_v28, %s2508_s21 }
 0xc35   :  { %v2202_v8 = vpop.eup %2201 }
 0xc36   :  { %v1330_v10 = vmul.f32 %v2202_v8, %v1314_v9 }
 0xc38   :  { %v1337_v13 = vsub.f32 %v1330_v10, %v1335_v11 }
 0xc3a   :  { %v1339_v14 = vrot.slane %v1337_v13, 6 }
 0xc3c   :  { %1340 = vrot.lane.b32.xlu0 %v1339_v14, %s2508_s21 }
 0xca5   :  { %v1349_v17 = vpop.permute.xlu1 %1348 }
 0xca6   :  { %v1351_v18 = vmul.f32 %v1349_v17, %v1331_v15 }
 0xca8   :  { %v2904_v19 = vadd.f32 %v1351_v18, %v2879_v22  ;;  %v1353_v22 = vld [vmem:[#allocation3] sm:$0x3]  ;;  %v1458_v18 = vld [vmem:[#allocation3] sm:$0xc] }
 0xcaa   :  { %1427 = vrot.lane.b32.xlu2 %v2904_v19, %s2508_s21 }
 0xcae   :  { %v1341_v48 = vpop.permute.xlu0 %1340 }
 0xcaf   :  { %v1343_v29 = vmul.f32 %v1341_v48, %v1331_v15 }
 0xcb1   :  { %v2909_v16 = vadd.f32 %v1343_v29, %v2884_v30 }
 0xcb3   :  { %v1355_v21 = vpack.c.bf16 %v2909_v16, %v2909_v16  ;;  %1441 = vrot.lane.b32.xlu1 %v2909_v16, %s2508_s21 }
 0xcb5   :  { %2040 = vmatmul.msk.bf16.vlgmr.msrb.gmra.mxu0 %vm240_vm0, %v1355_v21  ;;  %2041 = vmatmul.msk.bf16.vlgmr.msrb.gmra.mxu1 %vm240_vm0, %v1355_v21 }
 0xd04   :  { %v1428_v50 = vpop.permute.xlu2 %1427 }
 0xd25   :  { %v1442_v0 = vpop.permute.xlu1 %1441 }
 0xd32   :  { %v1368_v25 = vpop.f32.mrf.mxu0  ;;  %v1381_v26 = vpop.f32.mrf.mxu1 }
 0xd33   :  { %v1385_v27 = vadd.f32 %v1368_v25, %v1353_v22  ;;  %v1386_v37 = vadd.f32 %v1381_v26, %v1354_v33 }
 0xd35   :  { %v2042_v31 = vmul.f32 -1.442695, %v1385_v27  ;;  %v2043_v20 = vmul.f32 -1.442695, %v1386_v37  ;;  %v1459_v27 = vld [vmem:[#allocation3 + $0x18] sm:$0xc] }
 0xd37   :  { %2203 = vpow2.f32 %v2042_v31 }
 0xd3a   :  { %v1370_v32 = vpop.f32.mrf.mxu0  ;;  %v1383_v23 = vpop.f32.mrf.mxu1 }
 0xd3d   :  { %v2204_v30 = vpop.eup %2203 }
 0xd3e   :  { %v1393_v24 = vadd.f32 1.0, %v2204_v30 }
 0xd40   :  { %2205 = vrcp.f32 %v1393_v24  ;;  %v1406_v38 = vand.u32 2147483648, %v1393_v24  ;;  %v1404_v35 = vand.u32 2147483647, %v1393_v24  ;;  %vm1400_vm6 = vweird.f32 %v1393_v24 }
 0xd41   :  { %2207 = vtanh.f32 %v1386_v37 }
 0xd42   :  { %v1407_v12 = vor.u32 1.1754944e-38, %v1406_v38  ;;  %vm1405_vm8 = vcmp.eq.f32.partialorder %v1404_v35, 8.507059e+37  ;;  %2209 = vpow2.f32 %v2043_v20 }
 0xd46   :  { %v2206_v34 = vpop.eup %2205 }
 0xd47   :  { %v1396_v2 = vmul.f32 %v2206_v34, %v1393_v24  ;;  %vm1401_vm5 = vweird.f32 %v2206_v34  ;;  %v2208_v6 = vpop.eup %2207 }
 0xd48   :  { %vm1402_vm7 = vmor %vm1400_vm6, %vm1401_vm5  ;;  %v2210_v43 = vpop.eup %2209 }
 0xd49   :  { %v1397_v5 = vsub.f32 1.0, %v1396_v2  ;;  %v1394_v44 = vadd.f32 1.0, %v2210_v43 }
 0xd4b   :  { %v1398_v41 = vmul.f32 %v2206_v34, %v1397_v5  ;;  %2211 = vrcp.f32 %v1394_v44  ;;  %v1421_v57 = vand.u32 2147483648, %v1394_v44  ;;  %vm1415_vm10 = vweird.f32 %v1394_v44 }
 0xd4c   :  { %v1419_v58 = vand.u32 2147483647, %v1394_v44 }
 0xd4d   :  { %v1399_v42 = vadd.f32 %v2206_v34, %v1398_v41  ;;  %v1422_v60 = vor.u32 1.1754944e-38, %v1421_v57 }
 0xd4e   :  { %vm1420_vm12 = vcmp.eq.f32.partialorder %v1419_v58, 8.507059e+37 }
 0xd4f   :  { %v1403_v39 = vsel %vm1402_vm7, %v2206_v34, %v1399_v42 }
 0xd50   :  { %v1408_v40 = vsel %vm1405_vm8, %v1407_v12, %v1403_v39 }
 0xd51   :  { %v1431_v47 = vmul.f32 %v2208_v6, %v1408_v40  ;;  %v2212_v45 = vpop.eup %2211  ;;  %v1430_v52 = vmul.f32 %v1428_v50, %v1408_v40 }
 0xd52   :  { %v1411_v46 = vmul.f32 %v2212_v45, %v1394_v44  ;;  %vm1416_vm9 = vweird.f32 %v2212_v45 }
 0xd53   :  { %1433 = vrot.lane.b32.xlu0 %v1431_v47, %s2508_s21  ;;  %vm1417_vm11 = vmor %vm1415_vm10, %vm1416_vm9 }
 0xd54   :  { %v1412_v49 = vsub.f32 1.0, %v1411_v46 }
 0xd56   :  { %v1413_v51 = vmul.f32 %v2212_v45, %v1412_v49 }
 0xd58   :  { %v1414_v55 = vadd.f32 %v2212_v45, %v1413_v51 }
 0xd5a   :  { %v1418_v59 = vsel %vm1417_vm11, %v2212_v45, %v1414_v55 }
 0xd5b   :  { %v1423_v62 = vsel %vm1420_vm12, %v1422_v60, %v1418_v59 }
 0xdc5   :  { %v1434_v53 = vpop.permute.xlu0 %1433 }
 0xdc6   :  { %v1436_v54 = vadd.f32 %v1434_v53, %v1430_v52 }
 0xdc8   :  { %2213 = vtanh.f32 %v1436_v54  ;;  %v1451_v56 = vsub.f32 %v1436_v54, %v1428_v50 }
 0xdca   :  { %1453 = vrot.lane.b32.xlu0 %v1451_v56, %s2508_s21 }
 0xdce   :  { %v2214_v61 = vpop.eup %2213 }
 0xdcf   :  { %v1438_v63 = vmul.f32 %v2214_v61, %v1423_v62  ;;  %v1551_v61 = vld [vmem:[#allocation10 + $0xa] sm:$0x3] }
 0xdd1   :  { %v1444_v1 = vsub.f32 %v1438_v63, %v1442_v0 }
 0xdd3   :  { %1446 = vrot.lane.b32.xlu2 %v1444_v1, %s2508_s21 }
 0xe2d   :  { %v1447_v4 = vpop.permute.xlu2 %1446 }
 0xe2e   :  { %v1449_v28 = vmul.f32 %v1447_v4, %v1439_v3 }
 0xe30   :  { %v2921_v7 = vadd.f32 %v1449_v28, %v2909_v16 }
 0xe32   :  { %v1460_v36 = vpack.c.bf16 %v2921_v7, %v2921_v7  ;;  %v1553_v8 = vrot.slane %v2921_v7, 6 }
 0xe34   :  { %1554 = vrot.lane.b32.xlu0 %v1553_v8, %s2508_s21  ;;  %2044 = vmatmul.msk.bf16.vlgmr.msrb.gmra.mxu2 %vm240_vm0, %v1460_v36 }
 0xe35   :  { %2045 = vmatmul.msk.bf16.vlgmr.msrb.gmra.mxu3 %vm240_vm0, %v1460_v36 }
 0xe3c   :  { %v1454_v9 = vpop.permute.xlu0 %1453 }
 0xe3d   :  { %v1456_v10 = vmul.f32 %v1454_v9, %v1439_v3 }
 0xe3f   :  { %v2930_v11 = vadd.f32 %v1456_v10, %v2904_v19 }
 0xe41   :  { %v1538_v13 = vrot.slane %v2930_v11, 6 }
 0xe43   :  { %1539 = vrot.lane.b32.xlu1 %v1538_v13, %s2508_s21  ;;  %v1573_v13 = vld [vmem:[#allocation3] sm:$0x30] }
 0xea6   :  { %v1555_v58 = vpop.permute.xlu0 %1554 }
 0xeb5   :  { %v1540_v47 = vpop.permute.xlu1 %1539 }
 0xeb7   :  { %v1473_v14 = vpop.f32.mrf.mxu2 }
 0xeb8   :  { %v1492_v15 = vrot.slane %v1473_v14, 6  ;;  %v1486_v17 = vpop.f32.mrf.mxu3 }
 0xeb9   :  { %v1493_v26 = vrot.slane %v1486_v17, 6 }
 0xeba   :  { %v1496_v48 = vadd.f32 %v1492_v15, %v1458_v18 }
 0xebb   :  { %v1497_v31 = vadd.f32 %v1493_v26, %v1459_v27 }
 0xebc   :  { %v2046_v29 = vmul.f32 -1.442695, %v1496_v48 }
 0xebd   :  { %v2047_v35 = vmul.f32 -1.442695, %v1497_v31 }
 0xebe   :  { %2215 = vpow2.f32 %v2046_v29 }
 0xebf   :  { %v1475_v16 = vpop.f32.mrf.mxu2 }
 0xec0   :  { %v1488_v21 = vpop.f32.mrf.mxu3  ;;  %v1574_v16 = vld [vmem:[#allocation3 + $0x18] sm:$0x30] }
 0xec4   :  { %v2216_v22 = vpop.eup %2215 }
 0xec5   :  { %v1504_v25 = vadd.f32 1.0, %v2216_v22 }
 0xec7   :  { %2217 = vrcp.f32 %v1504_v25  ;;  %v1517_v30 = vand.u32 2147483648, %v1504_v25  ;;  %v1515_v33 = vand.u32 2147483647, %v1504_v25  ;;  %vm1511_vm14 = vweird.f32 %v1504_v25 }
 0xec8   :  { %2219 = vtanh.f32 %v1497_v31 }
 0xec9   :  { %v1518_v37 = vor.u32 1.1754944e-38, %v1517_v30  ;;  %vm1516_vm1 = vcmp.eq.f32.partialorder %v1515_v33, 8.507059e+37  ;;  %2221 = vpow2.f32 %v2047_v35 }
 0xecd   :  { %v2218_v19 = vpop.eup %2217 }
 0xece   :  { %v1507_v32 = vmul.f32 %v2218_v19, %v1504_v25  ;;  %vm1512_vm13 = vweird.f32 %v2218_v19  ;;  %v2220_v5 = vpop.eup %2219 }
 0xecf   :  { %vm1513_vm15 = vmor %vm1511_vm14, %vm1512_vm13  ;;  %v2222_v42 = vpop.eup %2221 }
 0xed0   :  { %v1508_v23 = vsub.f32 1.0, %v1507_v32  ;;  %v1505_v12 = vadd.f32 1.0, %v2222_v42 }
 0xed2   :  { %v1509_v24 = vmul.f32 %v2218_v19, %v1508_v23  ;;  %2223 = vrcp.f32 %v1505_v12  ;;  %v1532_v50 = vand.u32 2147483648, %v1505_v12  ;;  %vm1526_vm3 = vweird.f32 %v1505_v12 }
 0xed3   :  { %v1530_v51 = vand.u32 2147483647, %v1505_v12 }
 0xed4   :  { %v1510_v34 = vadd.f32 %v2218_v19, %v1509_v24  ;;  %v1533_v54 = vor.u32 1.1754944e-38, %v1532_v50 }
 0xed5   :  { %vm1531_vm5 = vcmp.eq.f32.partialorder %v1530_v51, 8.507059e+37 }
 0xed6   :  { %v1514_v2 = vsel %vm1513_vm15, %v2218_v19, %v1510_v34 }
 0xed7   :  { %v1519_v38 = vsel %vm1516_vm1, %v1518_v37, %v1514_v2 }
 0xed8   :  { %v1543_v41 = vmul.f32 %v2220_v5, %v1519_v38  ;;  %v2224_v39 = vpop.eup %2223  ;;  %v1542_v43 = vmul.f32 %v1540_v47, %v1519_v38 }
 0xed9   :  { %v1522_v6 = vmul.f32 %v2224_v39, %v1505_v12  ;;  %vm1527_vm2 = vweird.f32 %v2224_v39 }
 0xeda   :  { %1545 = vrot.lane.b32.xlu2 %v1543_v41, %s2508_s21  ;;  %vm1528_vm4 = vmor %vm1526_vm3, %vm1527_vm2 }
 0xedb   :  { %v1523_v40 = vsub.f32 1.0, %v1522_v6 }
 0xedd   :  { %v1524_v20 = vmul.f32 %v2224_v39, %v1523_v40 }
 0xedf   :  { %v1525_v46 = vadd.f32 %v2224_v39, %v1524_v20 }
 0xee1   :  { %v1529_v53 = vsel %vm1528_vm4, %v2224_v39, %v1525_v46 }
 0xee2   :  { %v1534_v56 = vsel %vm1531_vm5, %v1533_v54, %v1529_v53 }
 0xf34   :  { %v1546_v44 = vpop.permute.xlu2 %1545 }
 0xf35   :  { %v1548_v45 = vadd.f32 %v1546_v44, %v1542_v43 }
 0xf37   :  { %2225 = vtanh.f32 %v1548_v45  ;;  %v1565_v49 = vsub.f32 %v1548_v45, %v1540_v47 }
 0xf39   :  { %v1567_v52 = vrot.slane %v1565_v49, 2 }
 0xf3b   :  { %1568 = vrot.lane.b32.xlu2 %v1567_v52, %s2508_s21 }
 0xf3d   :  { %v2226_v55 = vpop.eup %2225 }
 0xf3e   :  { %v1550_v57 = vmul.f32 %v2226_v55, %v1534_v56  ;;  %v1666_v56 = vld [vmem:[#allocation10 + $0xc] sm:$0x3] }
 0xf40   :  { %v1557_v59 = vsub.f32 %v1550_v57, %v1555_v58 }
 0xf42   :  { %v1559_v60 = vrot.slane %v1557_v59, 2 }
 0xf44   :  { %1560 = vrot.lane.b32.xlu1 %v1559_v60, %s2508_s21 }
 0xf95   :  { %v1569_v62 = vpop.permute.xlu2 %1568 }
 0xf96   :  { %v1571_v63 = vmul.f32 %v1569_v62, %v1551_v61 }
 0xf98   :  { %v2938_v0 = vadd.f32 %v1571_v63, %v2930_v11 }
 0xf9a   :  { %v1653_v1 = vrot.slane %v2938_v0, 4 }
 0xf9c   :  { %1654 = vrot.lane.b32.xlu0 %v1653_v1, %s2508_s21 }
 0xfb6   :  { %v1561_v3 = vpop.permute.xlu1 %1560 }
 0xfb7   :  { %v1563_v4 = vmul.f32 %v1561_v3, %v1551_v61 }
 0xfb9   :  { %v2943_v28 = vadd.f32 %v1563_v4, %v2921_v7 }
 0xfbb   :  { %v1575_v36 = vpack.c.bf16 %v2943_v28, %v2943_v28  ;;  %v1668_v8 = vrot.slane %v2943_v28, 4 }
 0xfbd   :  { %1669 = vrot.lane.b32.xlu2 %v1668_v8, %s2508_s21  ;;  %2048 = vmatmul.msk.bf16.vlgmr.msra.gmra.mxu0 %vm240_vm0, %v1575_v36  ;;  %v1688_v8 = vld [vmem:[#allocation3] sm:$0xc0] }
 0xfbe   :  { %2049 = vmatmul.msk.bf16.vlgmr.msra.gmra.mxu1 %vm240_vm0, %v1575_v36 }
0x100e   :  { %v1655_v42 = vpop.permute.xlu0 %1654 }
0x1017   :  { %v1670_v53 = vpop.permute.xlu2 %1669 }
0x103a   :  { %v1588_v9 = vpop.f32.mrf.mxu0 }
0x103b   :  { %v1607_v10 = vrot.slane %v1588_v9, 4  ;;  %v1601_v11 = vpop.f32.mrf.mxu1 }
0x103c   :  { %v1608_v29 = vrot.slane %v1601_v11, 4 }
0x103d   :  { %v1611_v14 = vadd.f32 %v1607_v10, %v1573_v13 }
0x103e   :  { %v1612_v22 = vadd.f32 %v1608_v29, %v1574_v16 }
0x103f   :  { %v2050_v15 = vmul.f32 -1.442695, %v1611_v14 }
0x1040   :  { %v2051_v37 = vmul.f32 -1.442695, %v1612_v22 }
0x1041   :  { %2227 = vpow2.f32 %v2050_v15 }
0x1042   :  { %v1590_v7 = vpop.f32.mrf.mxu0 }
0x1043   :  { %v1603_v17 = vpop.f32.mrf.mxu1  ;;  %v1689_v7 = vld [vmem:[#allocation3 + $0x18] sm:$0xc0] }
0x1047   :  { %v2228_v18 = vpop.eup %2227 }
0x1048   :  { %v1619_v48 = vadd.f32 1.0, %v2228_v18 }
0x104a   :  { %2229 = vrcp.f32 %v1619_v48  ;;  %v1632_v27 = vand.u32 2147483648, %v1619_v48  ;;  %v1630_v31 = vand.u32 2147483647, %v1619_v48  ;;  %vm1626_vm7 = vweird.f32 %v1619_v48 }
0x104b   :  { %2231 = vtanh.f32 %v1612_v22 }
0x104c   :  { %v1633_v23 = vor.u32 1.1754944e-38, %v1632_v27  ;;  %vm1631_vm9 = vcmp.eq.f32.partialorder %v1630_v31, 8.507059e+37  ;;  %2233 = vpow2.f32 %v2051_v37  ;;  %v1800_v37 = vld [vmem:[#allocation18 + $0x28] sm:$0xff] }
0x1050   :  { %v2230_v21 = vpop.eup %2229 }
0x1051   :  { %v1622_v25 = vmul.f32 %v2230_v21, %v1619_v48  ;;  %vm1627_vm6 = vweird.f32 %v2230_v21  ;;  %v2232_v24 = vpop.eup %2231 }
0x1052   :  { %vm1628_vm8 = vmor %vm1626_vm7, %vm1627_vm6  ;;  %v2234_v2 = vpop.eup %2233  ;;  %vm1830_vm7 = vcmask 1041408  }
0x1053   :  { %v1623_v26 = vsub.f32 1.0, %v1622_v25  ;;  %v1620_v5 = vadd.f32 1.0, %v2234_v2 }
0x1055   :  { %v1624_v19 = vmul.f32 %v2230_v21, %v1623_v26  ;;  %2235 = vrcp.f32 %v1620_v5  ;;  %v1647_v43 = vand.u32 2147483648, %v1620_v5  ;;  %vm1641_vm11 = vweird.f32 %v1620_v5 }
0x1056   :  { %v1645_v44 = vand.u32 2147483647, %v1620_v5 }
0x1057   :  { %v1625_v32 = vadd.f32 %v2230_v21, %v1624_v19  ;;  %v1648_v49 = vor.u32 1.1754944e-38, %v1647_v43 }
0x1058   :  { %vm1646_vm13 = vcmp.eq.f32.partialorder %v1645_v44, 8.507059e+37 }
0x1059   :  { %v1629_v30 = vsel %vm1628_vm8, %v2230_v21, %v1625_v32 }
0x105a   :  { %v1634_v33 = vsel %vm1631_vm9, %v1633_v23, %v1629_v30 }
0x105b   :  { %v1658_v34 = vmul.f32 %v2232_v24, %v1634_v33  ;;  %v2236_v38 = vpop.eup %2235  ;;  %v1657_v39 = vmul.f32 %v1655_v42, %v1634_v33  ;;  %v1802_v33 = vld [vmem:[#allocation18 + $0x38] sm:$0xff] }
0x105c   :  { %v1637_v41 = vmul.f32 %v2236_v38, %v1620_v5  ;;  %vm1642_vm10 = vweird.f32 %v2236_v38  ;;  %1818 = vmatpush.msrb.mxu0 %v1802_v33  ;;  %v1799_v5 = vld [vmem:[#allocation18 + $0x20] sm:$0xff] }
0x105d   :  { %1660 = vrot.lane.b32.xlu1 %v1658_v34, %s2508_s21  ;;  %vm1643_vm12 = vmor %vm1641_vm11, %vm1642_vm10  ;;  %v1801_v34 = vld [vmem:[#allocation18 + $0x30] sm:$0xff] }
0x105e   :  { %v1638_v35 = vsub.f32 1.0, %v1637_v41  ;;  %1819 = vmatpush.msrb.mxu0 %v1801_v34  ;;  %v1798_v41 = vld [vmem:[#allocation18 + $0x18] sm:$0xff] }
0x1060   :  { %v1639_v12 = vmul.f32 %v2236_v38, %v1638_v35  ;;  %1820 = vmatpush.msrb.mxu0 %v1800_v37  ;;  %v1797_v35 = vld [vmem:[#allocation18 + $0x10] sm:$0xff] }
0x1062   :  { %v1640_v47 = vadd.f32 %v2236_v38, %v1639_v12  ;;  %1821 = vmatpush.msrb.mxu0 %v1799_v5 }
0x1064   :  { %v1644_v46 = vsel %vm1643_vm12, %v2236_v38, %v1640_v47  ;;  %1822 = vmatpush.msrb.mxu0 %v1798_v41 }
0x1065   :  { %v1649_v51 = vsel %vm1646_vm13, %v1648_v49, %v1644_v46 }
0x1066   :  { %1823 = vmatpush.msrb.mxu0 %v1797_v35 }
0x10cf   :  { %v1661_v6 = vpop.permute.xlu1 %1660 }
0x10d0   :  { %v1663_v40 = vadd.f32 %v1661_v6, %v1657_v39 }
0x10d2   :  { %2237 = vtanh.f32 %v1663_v40  ;;  %v1680_v20 = vsub.f32 %v1663_v40, %v1655_v42 }
0x10d4   :  { %v1682_v45 = vrot.slane %v1680_v20, 4 }
0x10d6   :  { %1683 = vrot.lane.b32.xlu1 %v1682_v45, %s2508_s21 }
0x10d8   :  { %v2238_v50 = vpop.eup %2237 }
0x10d9   :  { %v1665_v52 = vmul.f32 %v2238_v50, %v1649_v51 }
0x10db   :  { %v1672_v54 = vsub.f32 %v1665_v52, %v1670_v53 }
0x10dd   :  { %v1674_v55 = vrot.slane %v1672_v54, 4 }
0x10df   :  { %1675 = vrot.lane.b32.xlu0 %v1674_v55, %s2508_s21  ;;  %v1796_v55 = vld [vmem:[#allocation18 + $0x8] sm:$0xff] }
0x10e0   :  { %1824 = vmatpush.msrb.mxu0 %v1796_v55 }
0x1148   :  { %v1684_v57 = vpop.permute.xlu1 %1683 }
0x1149   :  { %v1686_v58 = vmul.f32 %v1684_v57, %v1666_v56  ;;  %v1781_v57 = vld [vmem:[#allocation10 + $0xe] sm:$0x3] }
0x114b   :  { %v1687_v59 = vadd.f32 %v1686_v58, %v2938_v0 }
0x114d   :  { %v1768_v60 = vrot.slane %v1687_v59, 2 }
0x114f   :  { %1769 = vrot.lane.b32.xlu2 %v1768_v60, %s2508_s21 }
0x1151   :  { %v1676_v61 = vpop.permute.xlu0 %1675 }
0x1152   :  { %v1678_v62 = vmul.f32 %v1676_v61, %v1666_v56  ;;  %v1795_v56 = vld [vmem:[#allocation18] sm:$0xff]  ;;  %v2106_v61 = vld [vmem:[%s2992_s11] ss:$0 sm:$0xff] }
0x1153   :  { %1825 = vmatpush.msrb.mxu0 %v1795_v56 }
0x1154   :  { %v2957_v63 = vadd.f32 %v1678_v62, %v2943_v28 }
0x1156   :  { %v1690_v1 = vpack.c.bf16 %v2957_v63, %v2957_v63  ;;  %v1783_v3 = vrot.slane %v2957_v63, 2 }
0x1158   :  { %1784 = vrot.lane.b32.xlu1 %v1783_v3, %s2508_s21  ;;  %2052 = vmatmul.msk.bf16.vlgmr.msra.gmra.mxu2 %vm240_vm0, %v1690_v1 }
0x1159   :  { %2053 = vmatmul.msk.bf16.vlgmr.msra.gmra.mxu3 %vm240_vm0, %v1690_v1 }
0x11a9   :  { %v1770_v12 = vpop.permute.xlu2 %1769 }
0x11ca   :  { %v1785_v52 = vpop.permute.xlu1 %1784 }
0x11db   :  { %v1703_v0 = vpop.f32.mrf.mxu2 }
0x11dc   :  { %v1722_v4 = vrot.slane %v1703_v0, 2  ;;  %v1716_v36 = vpop.f32.mrf.mxu3 }
0x11dd   :  { %v1723_v15 = vrot.slane %v1716_v36, 2 }
0x11de   :  { %v1726_v9 = vadd.f32 %v1722_v4, %v1688_v8 }
0x11df   :  { %v1727_v18 = vadd.f32 %v1723_v15, %v1689_v7 }
0x11e0   :  { %v2054_v10 = vmul.f32 -1.442695, %v1726_v9 }
0x11e1   :  { %v2055_v23 = vmul.f32 -1.442695, %v1727_v18 }
0x11e2   :  { %2239 = vpow2.f32 %v2054_v10 }
0x11e3   :  { %v1705_v28 = vpop.f32.mrf.mxu2 }
0x11e4   :  { %v1718_v11 = vpop.f32.mrf.mxu3 }
0x11e5   :  { %v1842_v11 = vld [vmem:[%s2993_s12] sm:$0x3] }
0x11e8   :  { %v2240_v13 = vpop.eup %2239 }
0x11e9   :  { %v1734_v14 = vadd.f32 1.0, %v2240_v13  ;;  %v1844_v13 = vld [vmem:[%s2994_s13] sm:$0x3] }
0x11eb   :  { %2241 = vrcp.f32 %v1734_v14  ;;  %v1747_v16 = vand.u32 2147483648, %v1734_v14  ;;  %v1745_v22 = vand.u32 2147483647, %v1734_v14  ;;  %vm1741_vm15 = vweird.f32 %v1734_v14 }
0x11ec   :  { %2243 = vtanh.f32 %v1727_v18 }
0x11ed   :  { %v1748_v26 = vor.u32 1.1754944e-38, %v1747_v16  ;;  %vm1746_vm2 = vcmp.eq.f32.partialorder %v1745_v22, 8.507059e+37  ;;  %2245 = vpow2.f32 %v2055_v23 }
0x11f1   :  { %v2242_v17 = vpop.eup %2241 }
0x11f2   :  { %v1737_v48 = vmul.f32 %v2242_v17, %v1734_v14  ;;  %vm1742_vm14 = vweird.f32 %v2242_v17  ;;  %v2244_v19 = vpop.eup %2243 }
0x11f3   :  { %vm1743_vm1 = vmor %vm1741_vm15, %vm1742_vm14  ;;  %v2246_v30 = vpop.eup %2245 }
0x11f4   :  { %v1738_v29 = vsub.f32 1.0, %v1737_v48  ;;  %v1735_v24 = vadd.f32 1.0, %v2246_v30 }
0x11f6   :  { %v1739_v21 = vmul.f32 %v2242_v17, %v1738_v29  ;;  %2247 = vrcp.f32 %v1735_v24  ;;  %v1762_v43 = vand.u32 2147483648, %v1735_v24  ;;  %vm1756_vm4 = vweird.f32 %v1735_v24 }
0x11f7   :  { %v1760_v44 = vand.u32 2147483647, %v1735_v24 }
0x11f8   :  { %v1740_v25 = vadd.f32 %v2242_v17, %v1739_v21  ;;  %v1763_v46 = vor.u32 1.1754944e-38, %v1762_v43 }
0x11f9   :  { %vm1761_vm6 = vcmp.eq.f32.partialorder %v1760_v44, 8.507059e+37 }
0x11fa   :  { %v1744_v27 = vsel %vm1743_vm1, %v2242_v17, %v1740_v25 }
0x11fb   :  { %v1749_v31 = vsel %vm1746_vm2, %v1748_v26, %v1744_v27 }
0x11fc   :  { %v1773_v32 = vmul.f32 %v2244_v19, %v1749_v31  ;;  %v2248_v2 = vpop.eup %2247  ;;  %v1772_v6 = vmul.f32 %v1770_v12, %v1749_v31 }
0x11fd   :  { %v1752_v38 = vmul.f32 %v2248_v2, %v1735_v24  ;;  %vm1757_vm3 = vweird.f32 %v2248_v2 }
0x11fe   :  { %1775 = vrot.lane.b32.xlu0 %v1773_v32, %s2508_s21  ;;  %vm1758_vm5 = vmor %vm1756_vm4, %vm1757_vm3 }
0x11ff   :  { %v1753_v42 = vsub.f32 1.0, %v1752_v38 }
0x1201   :  { %v1754_v39 = vmul.f32 %v2248_v2, %v1753_v42 }
0x1203   :  { %v1755_v20 = vadd.f32 %v2248_v2, %v1754_v39 }
0x1205   :  { %v1759_v45 = vsel %vm1758_vm5, %v2248_v2, %v1755_v20 }
0x1206   :  { %v1764_v50 = vsel %vm1761_vm6, %v1763_v46, %v1759_v45 }
0x1270   :  { %v1776_v40 = vpop.permute.xlu0 %1775 }
0x1271   :  { %v1778_v47 = vadd.f32 %v1776_v40, %v1772_v6 }
0x1273   :  { %2249 = vtanh.f32 %v1778_v47 }
0x1279   :  { %v2250_v49 = vpop.eup %2249 }
0x127a   :  { %v1780_v51 = vmul.f32 %v2250_v49, %v1764_v50 }
0x127c   :  { %v1787_v53 = vsub.f32 %v1780_v51, %v1785_v52 }
0x127e   :  { %v1789_v54 = vrot.slane %v1787_v53, 6 }
0x1280   :  { %1790 = vrot.lane.b32.xlu2 %v1789_v54, %s2508_s21  ;;  %s2521_s21 = smov 125  }
0x12da   :  { %v1791_v58 = vpop.permute.xlu2 %1790 }
0x12db   :  { %v1793_v59 = vmul.f32 %v1791_v58, %v1781_v57 }
0x12dd   :  { %v1794_v60 = vadd.f32 %v1793_v59, %v2957_v63 }
0x12df   :  { %2056 = vmatmul.msk.f32.vlgmr.msrb.gmra.mxu0 %vm240_vm0, %v1794_v60  ;;  %vm1851_vm0 = vcmask 17408  }
0x135c   :  { %v1827_v62 = vpop.f32.mrf.mxu0 }
0x135d   :  { %v1828_v1 = vadd.f32 %v2106_v61, %v1827_v62 }
0x135f   :  { %v1831_v3 = vsel %vm1830_vm7, %v1828_v1, -inf }
0x1360   :  { %1832 = vmax.xlane.f32.xlu0 %v1831_v3 }
0x13d3   :  { %v1833_v0 = vpop.xlane.xlu0 %1832 }
0x13d4   :  { %v1834_v4 = vsub.f32 %v1828_v1, %v1833_v0 }
0x13d6   :  { %v1835_v36 = vmul.f32 1.442695, %v1834_v4 }
0x13d8   :  { %2251 = vpow2.f32 %v1835_v36 }
0x13de   :  { %v2252_v8 = vpop.eup %2251 }
0x13df   :  { %v1837_v9 = vsel %vm1830_vm7, %v2252_v8, 0.0 }
0x13e0   :  { %1838 = vadd.xlane.f32.xlu1 %v1837_v9 }
0x1453   :  { %v1839_v10 = vpop.xlane.xlu1 %1838 }
0x1454   :  { %2253 = vrcp.f32 %v1839_v10 }
0x145a   :  { %v2254_v63 = vpop.eup %2253 }
0x145b   :  { %v1841_v28 = vmul.f32 %v2254_v63, %v2252_v8 }
0x145d   :  { %1846 = vrot.lane.b32.xlu2 %v1841_v28, %s2521_s21  ;;  %v1843_v15 = vmul.f32 %v1842_v11, %v1841_v28 }
0x14b7   :  { %v1847_v14 = vpop.permute.xlu2 %1846 }
0x14b8   :  { %v1849_v7 = vmul.f32 %v1847_v14, %v1844_v13 }
0x14ba   :  { %v1850_v17 = vadd.f32 %v1849_v7, %v1843_v15 }
0x14bc   :  { %1852 = vst.msk [vmem:[#allocation19] sm:$0x3] %vm1851_vm0, %v1850_v17 }
0x14bd   :  { %1863 = dma.vmem_to_hbm [thread:$0]  %s1859_s28, 32, %s1861_s0, [#allocation6]  }
0x14be   :  { %2505 = dma.done.wait [#allocation6], 32  }
0x14bf   :  { %2506 = vsyncadd [#allocation6], 4294967264 }
0x14c0   :  { %1868 = vsyncpa [#allocation5], 1 }
0x14c1   :  { %1869 = vsyncpa [#allocation8], 1 }
0x14c2   :  { %1870 = vsyncpa [#allocation11], 1 }
0x14c3   :  { %1871 = vsyncpa [#allocation14], 1 }
0x14c4   :  { %1872 = vsyncpa [#allocation17], 1 }
0x14c5   :  { %1873 = vsyncpa [#allocation6], 1 }

</bundles_post_ra>
